<compile_context>
chip_gen: v7x
topology: tpu7x:2x2x1
jax: 0.10.0
libtpu: 0.0.40
codegen_flags: <defaults>
</compile_context>

<pallas_src>
import jax
import jax.numpy as jnp
from jax.experimental import pallas as pl
from jax.experimental.pallas import tpu as pltpu

IN_FEAT = 3
HIDDEN = 256
OUT_FEAT = 16


def pos2weight_kernel(xT_ref, w1_ref, b1_ref, w2_ref, b2_ref, oT_ref):
    # xT_ref: (3, tile_n)      positions on the lane axis
    # w1_ref: (256, 3)         torch Linear(3, 256).weight
    # b1_ref: (256, 1)
    # w2_ref: (16, 256)        torch Linear(256, 16).weight
    # b2_ref: (16, 1)
    # oT_ref: (16, tile_n)     lane-dense output tile
    xT = xT_ref[...].astype(jnp.float32)

    # Layer 1 (contraction width 3): VPU broadcast multiply-adds, not the MXU.
    # hT[j, i] = sum_k W1[j, k] * xT[k, i] + b1[j]
    hT = (w1_ref[:, 0:1] * xT[0:1, :]
          + w1_ref[:, 1:2] * xT[1:2, :]
          + (w1_ref[:, 2:3] * xT[2:3, :] + b1_ref[...]))
    hT = jnp.maximum(hT, 0.0)  # ReLU on the VPU

    # Layer 2 on the MXU: yT (16, tile_n) = W2 (16,256) @ hT (256, tile_n)
    yT = jnp.dot(w2_ref[...], hT, preferred_element_type=jnp.float32) + b2_ref[...]
    oT_ref[...] = yT.astype(oT_ref.dtype)


def pos2weight(x, w1, b1, w2, b2, *, tile_n=4096):
    """x: (N, 3); w1: (256, 3); b1: (256,); w2: (16, 256); b2: (16,) -> (N, 16)."""
    assert tile_n % 128 == 0, "tile_n must be a multiple of 128 (lane width)"
    N = x.shape[0]

    # Lane-align the problem, shrink the tile if the problem is smaller than
    # one tile, then pad N up to a multiple of the tile (no caller-side assert).
    n_lane = pl.cdiv(N, 128) * 128
    tile = min(tile_n, n_lane)
    n_pad = pl.cdiv(n_lane, tile) * tile

    xT = jnp.pad(x.T, ((0, 0), (0, n_pad - N)))                 # (3, n_pad)
    w1f = w1.astype(jnp.float32)                                # (256, 3)
    b1c = b1.reshape(HIDDEN, 1).astype(jnp.float32)             # (256, 1)
    w2f = w2.astype(jnp.float32)                                # (16, 256)
    b2c = b2.reshape(OUT_FEAT, 1).astype(jnp.float32)           # (16, 1)

    grid = (n_pad // tile,)
    yT = pl.pallas_call(
        pos2weight_kernel,
        out_shape=jax.ShapeDtypeStruct((OUT_FEAT, n_pad), x.dtype),
        grid_spec=pltpu.PrefetchScalarGridSpec(
            num_scalar_prefetch=0,
            grid=grid,
            in_specs=[
                pl.BlockSpec((IN_FEAT, tile), lambda i: (0, i)),     # xT tile
                pl.BlockSpec((HIDDEN, IN_FEAT), lambda i: (0, 0)),   # W1 (resident)
                pl.BlockSpec((HIDDEN, 1), lambda i: (0, 0)),         # b1
                pl.BlockSpec((OUT_FEAT, HIDDEN), lambda i: (0, 0)),  # W2 (resident)
                pl.BlockSpec((OUT_FEAT, 1), lambda i: (0, 0)),       # b2
            ],
            out_specs=pl.BlockSpec((OUT_FEAT, tile), lambda i: (0, i)),
        ),
        compiler_params=pltpu.CompilerParams(
            dimension_semantics=("parallel",),
            vmem_limit_bytes=32 << 20,
        ),
    )(xT, w1f, b1c, w2f, b2c)

    return yT[:, :N].T                                           # (N, 16)


def init_params(key):
    # Deterministic synthetic init mimicking nn.Linear's uniform(-1/sqrt(fan_in), +)
    # Weights are kept in PyTorch layout: (out_features, in_features).
    k1, k2, k3, k4 = jax.random.split(key, 4)
    bound1 = 1.0 / jnp.sqrt(IN_FEAT)
    bound2 = 1.0 / jnp.sqrt(HIDDEN)
    w1 = jax.random.uniform(k1, (HIDDEN, IN_FEAT), jnp.float32, -bound1, bound1)
    b1 = jax.random.uniform(k2, (HIDDEN,), jnp.float32, -bound1, bound1)
    w2 = jax.random.uniform(k3, (OUT_FEAT, HIDDEN), jnp.float32, -bound2, bound2)
    b2 = jax.random.uniform(k4, (OUT_FEAT,), jnp.float32, -bound2, bound2)
    return w1, b1, w2, b2


def reference(x, w1, b1, w2, b2):
    h = jnp.maximum(x @ w1.T + b1, 0.0)
    return h @ w2.T + b2


if __name__ == "__main__":
    key = jax.random.PRNGKey(0)
    kx, kp = jax.random.split(key)

    # Small demo shape; deliberately NOT a multiple of 128 to exercise padding.
    N = 300
    x = jax.random.normal(kx, (N, IN_FEAT), jnp.float32)
    w1, b1, w2, b2 = init_params(kp)

    run = jax.jit(pos2weight)
    out = jax.block_until_ready(run(x, w1, b1, w2, b2))

    ref = reference(x, w1, b1, w2, b2)
    assert out.shape == (N, OUT_FEAT)
    assert jnp.allclose(out, ref, atol=1e-5, rtol=1e-5), "mismatch vs pure-JAX reference"

    print("KERNEL_OK")
</pallas_src>

<mosaic_0001>
module attributes {stable_mosaic.version = 11 : i64} {
  func.func @pos2weight_kernel(%arg0: i32, %arg1: memref<3x384xf32, #tpu.memory_space<vmem>>, %arg2: memref<256x3xf32, #tpu.memory_space<vmem>>, %arg3: memref<256x1xf32, #tpu.memory_space<vmem>>, %arg4: memref<16x256xf32, #tpu.memory_space<vmem>>, %arg5: memref<16x1xf32, #tpu.memory_space<vmem>>, %arg6: memref<16x384xf32, #tpu.memory_space<vmem>>) attributes {dimension_semantics = [#tpu.dimension_semantics<parallel>], iteration_bounds = array<i64: 1>, scalar_prefetch = 0 : i64, scratch_operands = 0 : i64, tpu.core_type = #tpu.core_type<tc>, window_params = [{transform_indices = @transform_0, window_bounds = array<i64: 3, 384>}, {pipeline_mode = #tpu.pipeline_mode<synchronous>, transform_indices = @transform_1, window_bounds = array<i64: 256, 3>}, {pipeline_mode = #tpu.pipeline_mode<synchronous>, transform_indices = @transform_2, window_bounds = array<i64: 256, 1>}, {pipeline_mode = #tpu.pipeline_mode<synchronous>, transform_indices = @transform_3, window_bounds = array<i64: 16, 256>}, {pipeline_mode = #tpu.pipeline_mode<synchronous>, transform_indices = @transform_4, window_bounds = array<i64: 16, 1>}, {transform_indices = @transform_5, window_bounds = array<i64: 16, 384>}]} {
    %c0 = arith.constant 0 : index
    %c0_0 = arith.constant 0 : index
    %0 = vector.load %arg1[%c0, %c0_0] : memref<3x384xf32, #tpu.memory_space<vmem>>, vector<3x384xf32>
    %c0_1 = arith.constant 0 : index
    %c0_2 = arith.constant 0 : index
    %1 = vector.load %arg2[%c0_1, %c0_2] : memref<256x3xf32, #tpu.memory_space<vmem>>, vector<256x1xf32>
    %2 = vector.extract_strided_slice %0 {offsets = [0, 0], sizes = [1, 384], strides = [1, 1]} : vector<3x384xf32> to vector<1x384xf32>
    %3 = vector.broadcast %1 : vector<256x1xf32> to vector<256x384xf32>
    %4 = vector.broadcast %2 : vector<1x384xf32> to vector<256x384xf32>
    %5 = arith.mulf %3, %4 : vector<256x384xf32>
    %c0_3 = arith.constant 0 : index
    %c1 = arith.constant 1 : index
    %6 = vector.load %arg2[%c0_3, %c1] : memref<256x3xf32, #tpu.memory_space<vmem>>, vector<256x1xf32>
    %7 = vector.extract_strided_slice %0 {offsets = [1, 0], sizes = [1, 384], strides = [1, 1]} : vector<3x384xf32> to vector<1x384xf32>
    %8 = vector.broadcast %6 : vector<256x1xf32> to vector<256x384xf32>
    %9 = vector.broadcast %7 : vector<1x384xf32> to vector<256x384xf32>
    %10 = arith.mulf %8, %9 : vector<256x384xf32>
    %11 = arith.addf %5, %10 : vector<256x384xf32>
    %c0_4 = arith.constant 0 : index
    %c2 = arith.constant 2 : index
    %12 = vector.load %arg2[%c0_4, %c2] : memref<256x3xf32, #tpu.memory_space<vmem>>, vector<256x1xf32>
    %13 = vector.extract_strided_slice %0 {offsets = [2, 0], sizes = [1, 384], strides = [1, 1]} : vector<3x384xf32> to vector<1x384xf32>
    %14 = vector.broadcast %12 : vector<256x1xf32> to vector<256x384xf32>
    %15 = vector.broadcast %13 : vector<1x384xf32> to vector<256x384xf32>
    %16 = arith.mulf %14, %15 : vector<256x384xf32>
    %c0_5 = arith.constant 0 : index
    %c0_6 = arith.constant 0 : index
    %17 = vector.load %arg3[%c0_5, %c0_6] : memref<256x1xf32, #tpu.memory_space<vmem>>, vector<256x1xf32>
    %18 = vector.broadcast %17 : vector<256x1xf32> to vector<256x384xf32>
    %19 = arith.addf %16, %18 : vector<256x384xf32>
    %20 = arith.addf %11, %19 : vector<256x384xf32>
    %cst = arith.constant 0.000000e+00 : f32
    %21 = vector.broadcast %cst : f32 to vector<256x384xf32>
    %22 = arith.maximumf %20, %21 : vector<256x384xf32>
    %c0_7 = arith.constant 0 : index
    %c0_8 = arith.constant 0 : index
    %23 = vector.load %arg4[%c0_7, %c0_8] : memref<16x256xf32, #tpu.memory_space<vmem>>, vector<16x256xf32>
    %cst_9 = arith.constant dense<0.000000e+00> : vector<16x384xf32>
    %24 = tpu.matmul %23, %22, %cst_9 {dimension_numbers = #tpu.dot_dimension_numbers<[1], [0], [0], [1], [0, 0, 1, 1], [], []>} : vector<16x256xf32>, vector<256x384xf32>, vector<16x384xf32> -> vector<16x384xf32>
    %c0_10 = arith.constant 0 : index
    %c0_11 = arith.constant 0 : index
    %25 = vector.load %arg5[%c0_10, %c0_11] : memref<16x1xf32, #tpu.memory_space<vmem>>, vector<16x1xf32>
    %26 = vector.broadcast %25 : vector<16x1xf32> to vector<16x384xf32>
    %27 = arith.addf %24, %26 : vector<16x384xf32>
    %c0_12 = arith.constant 0 : index
    %c0_13 = arith.constant 0 : index
    %28 = vector.load %arg6[%c0_12, %c0_13] : memref<16x384xf32, #tpu.memory_space<vmem>>, vector<16x384xf32>
    tpu.vector_store %arg6[%c0_12, %c0_13], %27 {strides = array<i32>} : memref<16x384xf32, #tpu.memory_space<vmem>>, vector<16x384xf32>,
    return
  }
  func.func @transform_0(%arg0: i32) -> (i32, i32) {
    %c0_i32 = arith.constant 0 : i32
    %c0_i32_0 = arith.constant 0 : i32
    return %c0_i32, %arg0 : i32, i32
  }
  func.func @transform_1(%arg0: i32) -> (i32, i32) {
    %c0_i32 = arith.constant 0 : i32
    %c0_i32_0 = arith.constant 0 : i32
    %c0_i32_1 = arith.constant 0 : i32
    return %c0_i32, %c0_i32_0 : i32, i32
  }
  func.func @transform_2(%arg0: i32) -> (i32, i32) {
    %c0_i32 = arith.constant 0 : i32
    %c0_i32_0 = arith.constant 0 : i32
    %c0_i32_1 = arith.constant 0 : i32
    return %c0_i32, %c0_i32_0 : i32, i32
  }
  func.func @transform_3(%arg0: i32) -> (i32, i32) {
    %c0_i32 = arith.constant 0 : i32
    %c0_i32_0 = arith.constant 0 : i32
    %c0_i32_1 = arith.constant 0 : i32
    return %c0_i32, %c0_i32_0 : i32, i32
  }
  func.func @transform_4(%arg0: i32) -> (i32, i32) {
    %c0_i32 = arith.constant 0 : i32
    %c0_i32_0 = arith.constant 0 : i32
    %c0_i32_1 = arith.constant 0 : i32
    return %c0_i32, %c0_i32_0 : i32, i32
  }
  func.func @transform_5(%arg0: i32) -> (i32, i32) {
    %c0_i32 = arith.constant 0 : i32
    %c0_i32_0 = arith.constant 0 : i32
    return %c0_i32, %arg0 : i32, i32
  }
}

</mosaic_0001>

<bundles_post_ra>
// kernel: pos2weight.1
= control target key start
LH: loop header
LB: loop body
LE: loop exit
PB: predicated region body
PF: predicated region fallthrough
CT: control target
= control target key end

     0   :  { %v3132_v0 = vmov 2   ;;  %v3140_v1 = vmov 0   ;;  %v216_v6 = vlaneseq  ;;  %v3134_v45 = vmov 1   ;;  %s3126_s1 = inlined_call_operand.vmem [shape: f32[256,3], index: 1, kind: input, shape index: {}]   ;;  %s3127_s0 = inlined_call_operand.vmem [shape: f32[3,384], index: 0, kind: input, shape index: {}]   ;;  %s3128_s2 = inlined_call_operand.vmem [shape: f32[256,1], index: 2, kind: input, shape index: {}]   ;;  %s3129_s4 = inlined_call_operand.vmem [shape: f32[16,1], index: 4, kind: input, shape index: {}]   ;;  %s3130_s3 = inlined_call_operand.vmem [shape: f32[16,256], index: 3, kind: input, shape index: {}]   ;;  %s3131_s5 = inlined_call_operand.vmem [shape: f32[16,384], index: 5, kind: output, shape index: {}]  }
   0x1   :  { %1734 = vset.pattern.permute.xlu0 %v3132_v0  ;;  %1732 = vset.pattern.permute.xlu1 %v3140_v1  ;;  %v1826_v2 = vld [vmem:[%s3126_s1 + $0x10] sm:$0xff]  ;;  %v1831_v3 = vld [vmem:[%s3126_s1] sm:$0xff]  ;;  %v1838_v4 = vld [vmem:[%s3126_s1 + $0x18] sm:$0xff] }
   0x2   :  { %66 = vperm.xlu1 %1732, %v1826_v2   ;;  %687 = vperm.xlu0 %1734, %v1831_v3   ;;  %v1843_v5 = vld [vmem:[%s3126_s1 + $0x20] sm:$0xff]  ;;  %v1850_v7 = vld [vmem:[%s3126_s1 + $0x28] sm:$0xff]  ;;  %v1852_v8 = vshrl.u32 %v216_v6, 7  ;;  %v1860_v9 = vld [vmem:[%s3126_s1 + $0x38] sm:$0xff] }
   0x3   :  { %v1865_v10 = vld [vmem:[%s3126_s1 + $0x8] sm:$0xff]  ;;  %v1893_v18 = vld [vmem:[%s3126_s1 + $0x58] sm:$0xff]  ;;  %v1901_v20 = vld [vmem:[%s3126_s1 + $0x30] sm:$0xff] }
   0x4   :  { %v1868_v11 = vsub.s32 0, %v1852_v8  ;;  %v1871_v12 = vsub.s32 2, %v1852_v8  ;;  %v1878_v13 = vld [vmem:[%s3126_s1 + $0x48] sm:$0xff]  ;;  %v1913_v22 = vld [vmem:[%s3126_s1 + $0x40] sm:$0xff]  ;;  %v1920_v23 = vld [vmem:[%s3126_s1 + $0x78] sm:$0xff]  ;;  %v2024_v41 = vsub.s32 1, %v1852_v8 }
   0x5   :  { %v21_v14 = vld [vmem:[%s3127_s0 + $0x8] sm:$0x7]  ;;  %v1925_v24 = vld [vmem:[%s3126_s1 + $0x50] sm:$0xff]  ;;  %v1937_v26 = vld [vmem:[%s3126_s1 + $0x60] sm:$0xff] }
   0x6   :  { %71 = vperm.xlu1 %1732, %v1838_v4   ;;  %703 = vperm.xlu0 %1734, %v1843_v5   ;;  %v227_v15 = vrot.slane %v21_v14, %v1868_v11  ;;  %v825_v16 = vrot.slane %v21_v14, %v1871_v12  ;;  %v1908_v21 = vld [vmem:[%s3126_s1 + $0x68] sm:$0xff]  ;;  %v1944_v27 = vld [vmem:[%s3126_s1 + $0x98] sm:$0xff]  ;;  %v1949_v28 = vld [vmem:[%s3126_s1 + $0x70] sm:$0xff]  ;;  %v478_v42 = vrot.slane %v21_v14, %v2024_v41 }
   0x7   :  { %v1932_v25 = vld [vmem:[%s3126_s1 + $0x88] sm:$0xff]  ;;  %v1961_v30 = vld [vmem:[%s3126_s1 + $0x80] sm:$0xff]  ;;  %v1968_v31 = vld [vmem:[%s3126_s1 + $0xb8] sm:$0xff] }
   0x8   :  { %v1887_v17 = vrot.slane %v227_v15, %v1868_v11  ;;  %v1896_v19 = vrot.slane %v825_v16, %v1871_v12  ;;  %v1956_v29 = vld [vmem:[%s3126_s1 + $0xa8] sm:$0xff]  ;;  %3174 = vst [vmem:[#allocation3_spill] sm:$0xff] %v1968_v31  ;;  %v1973_v32 = vld [vmem:[%s3126_s1 + $0x90] sm:$0xff]  ;;  %v1985_v34 = vld [vmem:[%s3126_s1 + $0xa0] sm:$0xff]  ;;  %v2035_v44 = vrot.slane %v478_v42, %v2024_v41 }
   0x9   :  { %v1980_v33 = vld [vmem:[%s3126_s1 + $0xc8] sm:$0xff]  ;;  %v1992_v35 = vld [vmem:[%s3126_s1 + $0xd8] sm:$0xff]  ;;  %v1997_v36 = vld [vmem:[%s3126_s1 + $0xb0] sm:$0xff] }
   0xa   :  { %81 = vperm.xlu1 %1732, %v1850_v7   ;;  %1739 = vset.pattern.permute.xlu0 %v3140_v1  ;;  %3173 = vst [vmem:[#allocation2_spill] sm:$0xff] %v1887_v17  ;;  %3175 = vst [vmem:[#allocation4_spill] sm:$0xff] %v1980_v33  ;;  %v2004_v37 = vld [vmem:[%s3126_s1 + $0xe8] sm:$0xff]  ;;  %v2009_v38 = vld [vmem:[%s3126_s1 + $0xc0] sm:$0xff] }
   0xb   :  { %56 = vperm.xlu0 %1739, %v1831_v3   ;;  %3176 = vst [vmem:[#allocation5_spill] sm:$0xff] %v1997_v36  ;;  %v2016_v39 = vld [vmem:[%s3126_s1 + $0xf8] sm:$0xff]  ;;  %v2021_v40 = vld [vmem:[%s3126_s1 + $0xd0] sm:$0xff]  ;;  %v2032_v43 = vld [vmem:[%s3126_s1 + $0xe0] sm:$0xff] }
   0xc   :  { %v2043_v46 = vld [vmem:[%s3126_s1 + $0xf0] sm:$0xff]  ;;  %v938_v47 = vld [vmem:[%s3128_s2 + $0x8] sm:$0xff]  ;;  %v945_v51 = vld [vmem:[%s3128_s2 + $0x40] sm:$0xff] }
   0xd   :  { %v939_v48 = vld [vmem:[%s3128_s2 + $0x10] sm:$0xff]  ;;  %v942_v49 = vld [vmem:[%s3128_s2 + $0x28] sm:$0xff]  ;;  %v937_v52 = vld [vmem:[%s3128_s2] sm:$0xff] }
   0xe   :  { %91 = vperm.xlu1 %1732, %v1860_v9   ;;  %v943_v50 = vld [vmem:[%s3128_s2 + $0x30] sm:$0xff]  ;;  %v949_v54 = vld [vmem:[%s3128_s2 + $0x60] sm:$0xff]  ;;  %v952_v55 = vld [vmem:[%s3128_s2 + $0x78] sm:$0xff] }
   0xf   :  { %61 = vperm.xlu0 %1739, %v1865_v10   ;;  %v947_v53 = vld [vmem:[%s3128_s2 + $0x50] sm:$0xff]  ;;  %v940_v56 = vld [vmem:[%s3128_s2 + $0x18] sm:$0xff]  ;;  %v941_v57 = vld [vmem:[%s3128_s2 + $0x20] sm:$0xff] }
  0x10   :  { %v944_v58 = vld [vmem:[%s3128_s2 + $0x38] sm:$0xff] }
  0x12   :  { %101 = vperm.xlu1 %1732, %v1878_v13  }
  0x13   :  { %76 = vperm.xlu0 %1739, %v1843_v5  }
  0x16   :  { %111 = vperm.xlu1 %1732, %v1893_v18  }
  0x17   :  { %86 = vperm.xlu0 %1739, %v1901_v20  }
  0x1a   :  { %121 = vperm.xlu1 %1732, %v1908_v21  }
  0x1b   :  { %96 = vperm.xlu0 %1739, %v1913_v22  }
  0x1e   :  { %131 = vperm.xlu1 %1732, %v1920_v23  }
  0x1f   :  { %106 = vperm.xlu0 %1739, %v1925_v24  }
  0x22   :  { %141 = vperm.xlu1 %1732, %v1932_v25  }
  0x23   :  { %116 = vperm.xlu0 %1739, %v1937_v26  }
  0x26   :  { %151 = vperm.xlu1 %1732, %v1944_v27  }
  0x27   :  { %126 = vperm.xlu0 %1739, %v1949_v28  }
  0x2a   :  { %161 = vperm.xlu1 %1732, %v1956_v29  }
  0x2b   :  { %136 = vperm.xlu0 %1739, %v1961_v30  }
  0x2e   :  { %171 = vperm.xlu1 %1732, %v1968_v31  }
  0x2f   :  { %146 = vperm.xlu0 %1739, %v1973_v32  }
  0x32   :  { %181 = vperm.xlu1 %1732, %v1980_v33  }
  0x33   :  { %156 = vperm.xlu0 %1739, %v1985_v34  }
  0x36   :  { %191 = vperm.xlu1 %1732, %v1992_v35  }
  0x37   :  { %166 = vperm.xlu0 %1739, %v1997_v36  }
  0x3a   :  { %201 = vperm.xlu1 %1732, %v2004_v37  }
  0x3b   :  { %176 = vperm.xlu0 %1739, %v2009_v38  }
  0x3e   :  { %211 = vperm.xlu1 %1732, %v2016_v39  }
  0x3f   :  { %186 = vperm.xlu0 %1739, %v2021_v40  }
  0x42   :  { %1733 = vset.pattern.permute.xlu1 %v3134_v45 }
  0x43   :  { %344 = vperm.xlu1 %1733, %v1865_v10   ;;  %196 = vperm.xlu0 %1739, %v2032_v43  }
  0x47   :  { %348 = vperm.xlu1 %1733, %v1826_v2   ;;  %206 = vperm.xlu0 %1739, %v2043_v46  }
  0x4b   :  { %356 = vperm.xlu1 %1733, %v1843_v5   ;;  %976 = vperm.xlu0 %1739, %v938_v47   ;;  %v946_v5 = vld [vmem:[%s3128_s2 + $0x48] sm:$0xff] }
  0x4f   :  { %364 = vperm.xlu1 %1733, %v1901_v20   ;;  %981 = vperm.xlu0 %1739, %v939_v48  }
  0x53   :  { %372 = vperm.xlu1 %1733, %v1913_v22   ;;  %996 = vperm.xlu0 %1739, %v942_v49   ;;  %v950_v49 = vld [vmem:[%s3128_s2 + $0x68] sm:$0xff] }
  0x57   :  { %1735 = vset.pattern.permute.xlu1 %v3132_v0  ;;  %1001 = vperm.xlu0 %1739, %v943_v50  }
  0x58   :  { %691 = vperm.xlu1 %1735, %v1865_v10  }
  0x5b   :  { %1011 = vperm.xlu0 %1739, %v945_v51  }
  0x5c   :  { %1736 = vset.pattern.permute.xlu1 %v3140_v1 }
  0x5d   :  { %971 = vperm.xlu1 %1736, %v937_v52  }
  0x5f   :  { %1021 = vperm.xlu0 %1739, %v947_v53  }
  0x61   :  { %1737 = vset.pattern.permute.xlu1 %v3132_v0 }
  0x62   :  { %695 = vperm.xlu1 %1737, %v1826_v2  }
  0x63   :  { %1031 = vperm.xlu0 %1739, %v949_v54  }
  0x66   :  { %699 = vperm.xlu1 %1737, %v1838_v4  }
  0x67   :  { %1046 = vperm.xlu0 %1739, %v952_v55  }
  0x6a   :  { %1738 = vset.pattern.permute.xlu1 %v3140_v1 }
  0x6b   :  { %986 = vperm.xlu1 %1738, %v940_v56   ;;  %1757 = vset.pattern.permute.xlu0 %v3134_v45 }
  0x6c   :  { %340 = vperm.xlu0 %1757, %v1831_v3  }
  0x6f   :  { %1740 = vset.pattern.permute.xlu1 %v3132_v0 }
  0x70   :  { %707 = vperm.xlu1 %1740, %v1850_v7   ;;  %352 = vperm.xlu0 %1757, %v1838_v4  }
  0x74   :  { %1741 = vset.pattern.permute.xlu1 %v3140_v1  ;;  %360 = vperm.xlu0 %1757, %v1850_v7  }
  0x75   :  { %991 = vperm.xlu1 %1741, %v941_v57   ;;  %v222_v57 = vsub.s32 4, %v1852_v8 }
  0x78   :  { %368 = vperm.xlu0 %1757, %v1860_v9  }
  0x79   :  { %1742 = vset.pattern.permute.xlu1 %v3132_v0 }
  0x7a   :  { %711 = vperm.xlu1 %1742, %v1901_v20  }
  0x7c   :  { %376 = vperm.xlu0 %1757, %v1878_v13  }
  0x7e   :  { %715 = vperm.xlu1 %1742, %v1860_v9  }
  0x80   :  { %384 = vperm.xlu0 %1757, %v1893_v18  }
  0x81   :  { %v2106_v59 = vpop.permute.xlu1 %66  ;;  %v2108_v60 = vpop.permute.xlu0 %687 }
  0x82   :  { %1743 = vset.pattern.permute.xlu1 %v3140_v1 }
  0x83   :  { %1006 = vperm.xlu1 %1743, %v944_v58   ;;  %v20_v58 = vld [vmem:[%s3127_s0] sm:$0x77] }
  0x84   :  { %392 = vperm.xlu0 %1757, %v1908_v21  }
  0x85   :  { %v2112_v61 = vpop.permute.xlu1 %71  ;;  %v2114_v62 = vpop.permute.xlu0 %703 }
  0x87   :  { %1744 = vset.pattern.permute.xlu1 %v3132_v0 }
  0x88   :  { %719 = vperm.xlu1 %1744, %v1913_v22   ;;  %400 = vperm.xlu0 %1757, %v1920_v23   ;;  %v948_v22 = vld [vmem:[%s3128_s2 + $0x58] sm:$0xff] }
  0x89   :  { %v2119_v63 = vpop.permute.xlu1 %81 }
  0x8a   :  { %v2121_v2 = vpop.permute.xlu0 %56 }
  0x8c   :  { %723 = vperm.xlu1 %1744, %v1878_v13   ;;  %404 = vperm.xlu0 %1757, %v1961_v30  }
  0x8d   :  { %v2125_v3 = vpop.permute.xlu1 %91 }
  0x8e   :  { %v2127_v4 = vpop.permute.xlu0 %61 }
  0x90   :  { %1745 = vset.pattern.permute.xlu1 %v3140_v1  ;;  %412 = vperm.xlu0 %1757, %v1973_v32  }
  0x91   :  { %v2134_v6 = vpop.permute.xlu1 %101  ;;  %1016 = vperm.xlu1 %1745, %v946_v5  }
  0x92   :  { %v2136_v7 = vpop.permute.xlu0 %76 }
  0x94   :  { %420 = vperm.xlu0 %1757, %v1985_v34  }
  0x95   :  { %v2139_v9 = vpop.permute.xlu1 %111  ;;  %1746 = vset.pattern.permute.xlu1 %v3134_v45 }
  0x96   :  { %380 = vperm.xlu1 %1746, %v1925_v24   ;;  %v2143_v10 = vpop.permute.xlu0 %86 }
  0x98   :  { %428 = vperm.xlu0 %1757, %v1997_v36  }
  0x99   :  { %v2146_v13 = vpop.permute.xlu1 %121 }
  0x9a   :  { %3177 = vst [vmem:[#allocation6_spill] sm:$0xff] %v2146_v13  ;;  %1747 = vset.pattern.permute.xlu1 %v3132_v0  ;;  %v2149_v14 = vpop.permute.xlu0 %96 }
  0x9b   :  { %727 = vperm.xlu1 %1747, %v1925_v24  }
  0x9c   :  { %436 = vperm.xlu0 %1757, %v2009_v38  }
  0x9d   :  { %v2153_v15 = vpop.permute.xlu1 %131 }
  0x9e   :  { %3178 = vst [vmem:[#allocation7_spill] sm:$0xff] %v2153_v15  ;;  %v2155_v16 = vpop.permute.xlu0 %106 }
  0x9f   :  { %3179 = vst [vmem:[#allocation8_spill] sm:$0xff] %v2155_v16  ;;  %731 = vperm.xlu1 %1747, %v1893_v18  }
  0xa0   :  { %444 = vperm.xlu0 %1757, %v2021_v40  }
  0xa1   :  { %v2159_v20 = vpop.permute.xlu1 %141 }
  0xa2   :  { %3180 = vst [vmem:[#allocation9_spill] sm:$0xff] %v2159_v20  ;;  %v2164_v42 = vpop.permute.xlu0 %116 }
  0xa3   :  { %3181 = vst [vmem:[#allocation10_spill] sm:$0xff] %v2164_v42  ;;  %1748 = vset.pattern.permute.xlu1 %v3140_v1  ;;  %v2368_v42 = vmul.f32 %v1887_v17, %v2121_v2 }
  0xa4   :  { %1026 = vperm.xlu1 %1748, %v948_v22   ;;  %452 = vperm.xlu0 %1757, %v2032_v43  }
  0xa5   :  { %v2168_v24 = vpop.permute.xlu1 %151 }
  0xa6   :  { %3182 = vst [vmem:[#allocation11_spill] sm:$0xff] %v2168_v24  ;;  %v2170_v38 = vpop.permute.xlu0 %126  ;;  %v954_v24 = vld [vmem:[%s3128_s2 + $0x88] sm:$0xff] }
  0xa7   :  { %3183 = vst [vmem:[#allocation12_spill] sm:$0xff] %v2170_v38  ;;  %v3205_v38 = vmov 1  }
  0xa8   :  { %1749 = vset.pattern.permute.xlu1 %v3134_v45  ;;  %460 = vperm.xlu0 %1757, %v2043_v46  }
  0xa9   :  { %v2174_v18 = vpop.permute.xlu1 %161  ;;  %388 = vperm.xlu1 %1749, %v1937_v26  }
  0xaa   :  { %3184 = vst [vmem:[#allocation13_spill] sm:$0xff] %v2174_v18  ;;  %v2177_v40 = vpop.permute.xlu0 %136 }
  0xab   :  { %3185 = vst [vmem:[#allocation14_spill] sm:$0xff] %v2177_v40 }
  0xac   :  { %1776 = vset.pattern.permute.xlu0 %v3132_v0 }
  0xad   :  { %v2180_v47 = vpop.permute.xlu1 %171  ;;  %1750 = vset.pattern.permute.xlu1 %v3132_v0  ;;  %751 = vperm.xlu0 %1776, %v1961_v30  }
  0xae   :  { %3186 = vst [vmem:[#allocation15_spill] sm:$0xff] %v2180_v47  ;;  %735 = vperm.xlu1 %1750, %v1937_v26   ;;  %v2185_v43 = vpop.permute.xlu0 %146 }
  0xaf   :  { %3187 = vst [vmem:[#allocation16_spill] sm:$0xff] %v2185_v43 }
  0xb1   :  { %v2187_v48 = vpop.permute.xlu1 %181  ;;  %763 = vperm.xlu0 %1776, %v1944_v27  }
  0xb2   :  { %3188 = vst [vmem:[#allocation17_spill] sm:$0xff] %v2187_v48  ;;  %739 = vperm.xlu1 %1750, %v1908_v21   ;;  %v2191_v46 = vpop.permute.xlu0 %156 }
  0xb3   :  { %3189 = vst [vmem:[#allocation18_spill] sm:$0xff] %v2191_v46 }
  0xb5   :  { %v2196_v50 = vpop.permute.xlu1 %191  ;;  %771 = vperm.xlu0 %1776, %v1956_v29  }
  0xb6   :  { %3190 = vst [vmem:[#allocation19_spill] sm:$0xff] %v2196_v50  ;;  %1751 = vset.pattern.permute.xlu1 %v3140_v1  ;;  %v2200_v26 = vpop.permute.xlu0 %166 }
  0xb7   :  { %3191 = vst [vmem:[#allocation20_spill] sm:$0xff] %v2200_v26  ;;  %1036 = vperm.xlu1 %1751, %v950_v49   ;;  %v820_v49 = vsub.s32 6, %v1852_v8 }
  0xb9   :  { %v2202_v30 = vpop.permute.xlu1 %201  ;;  %779 = vperm.xlu0 %1776, %v1968_v31   ;;  %v821_v47 = vrot.slane %v20_v58, %v820_v49 }
  0xba   :  { %3192 = vst [vmem:[#allocation21_spill] sm:$0xff] %v2202_v30  ;;  %v2205_v21 = vpop.permute.xlu0 %176  ;;  %v248_v30 = vmul.f32 %v1887_v17, %v2127_v4 }
  0xbb   :  { %3193 = vst [vmem:[#allocation22_spill] sm:$0xff] %v2205_v21  ;;  %1752 = vset.pattern.permute.xlu1 %v3134_v45 }
  0xbc   :  { %396 = vperm.xlu1 %1752, %v1949_v28  }
  0xbd   :  { %v2209_v51 = vpop.permute.xlu1 %211  ;;  %787 = vperm.xlu0 %1776, %v1980_v33  }
  0xbe   :  { %3194 = vst [vmem:[#allocation23_spill] sm:$0xff] %v2209_v51  ;;  %v2212_v52 = vpop.permute.xlu0 %186  ;;  %v953_v51 = vld [vmem:[%s3128_s2 + $0x80] sm:$0xff] }
  0xbf   :  { %3195 = vst [vmem:[#allocation24_spill] sm:$0xff] %v2212_v52 }
  0xc0   :  { %1753 = vset.pattern.permute.xlu1 %v3132_v0 }
  0xc1   :  { %743 = vperm.xlu1 %1753, %v1949_v28   ;;  %795 = vperm.xlu0 %1776, %v1992_v35  }
  0xc2   :  { %v2217_v53 = vpop.permute.xlu1 %344  ;;  %v2219_v54 = vpop.permute.xlu0 %196 }
  0xc3   :  { %3196 = vst [vmem:[#allocation25_spill] sm:$0xff] %v2219_v54  ;;  %v499_v50 = vmul.f32 %v2035_v44, %v2217_v53  ;;  %v2383_v54 = vmul.f32 %v1887_v17, %v2125_v3 }
  0xc5   :  { %747 = vperm.xlu1 %1753, %v1920_v23   ;;  %803 = vperm.xlu0 %1776, %v2004_v37   ;;  %v595_v49 = vadd.f32 %v499_v50, %v248_v30  ;;  %v2302_v30 = vmul.f32 %v1887_v17, %v2106_v59  ;;  %3208 = vst [vmem:[#allocation36_spill] sm:$0xff] %v2383_v54 }
  0xc6   :  { %v2223_v55 = vpop.permute.xlu1 %348  ;;  %v2225_v56 = vpop.permute.xlu0 %206 }
  0xc7   :  { %3197 = vst [vmem:[#allocation26_spill] sm:$0xff] %v2225_v56 }
  0xc9   :  { %1754 = vset.pattern.permute.xlu1 %v3134_v45  ;;  %811 = vperm.xlu0 %1776, %v2016_v39   ;;  %v951_v39 = vld [vmem:[%s3128_s2 + $0x70] sm:$0xff]  ;;  %v473_v45 = vsub.s32 5, %v1852_v8 }
  0xca   :  { %408 = vperm.xlu1 %1754, %v1932_v25   ;;  %v2230_v28 = vpop.permute.xlu1 %356  ;;  %v2232_v35 = vpop.permute.xlu0 %976 }
  0xcb   :  { %v474_v43 = vrot.slane %v20_v58, %v473_v45 }
  0xcd   :  { %1780 = vset.pattern.permute.xlu0 %v3140_v1 }
  0xce   :  { %1755 = vset.pattern.permute.xlu1 %v3132_v0  ;;  %v2236_v23 = vpop.permute.xlu1 %364  ;;  %v2238_v37 = vpop.permute.xlu0 %981  ;;  %v223_v0 = vrot.slane %v20_v58, %v222_v57  ;;  %v470_v57 = vrot.slane %v20_v58, %v2024_v41 }
  0xcf   :  { %755 = vperm.xlu1 %1755, %v1932_v25   ;;  %v219_v25 = vrot.slane %v20_v58, %v1868_v11 }
  0xd0   :  { %v2275_v18 = vrot.slane %v223_v0, %v1868_v11 }
  0xd1   :  { %v2272_v46 = vrot.slane %v219_v25, %v1868_v11  ;;  %v2290_v25 = vrot.slane %v470_v57, %v2024_v41  ;;  %v2343_v57 = vmul.f32 %v1896_v19, %v2114_v62 }
  0xd2   :  { %v2248_v5 = vpop.permute.xlu1 %372  ;;  %v2250_v22 = vpop.permute.xlu0 %996  ;;  %3199 = vst [vmem:[#allocation28_spill] sm:$0xff] %v2275_v18  ;;  %v250_v50 = vmul.f32 %v2275_v18, %v2106_v59  ;;  %v247_v33 = vmul.f32 %v2275_v18, %v2127_v4  ;;  %v2397_v21 = vmul.f32 %v2275_v18, %v2134_v6 }
  0xd3   :  { %1756 = vset.pattern.permute.xlu1 %v3140_v1  ;;  %3198 = vst [vmem:[#allocation27_spill] sm:$0xff] %v2272_v46  ;;  %v249_v45 = vmul.f32 %v2272_v46, %v2106_v59  ;;  %3203 = vst [vmem:[#allocation32_spill] sm:$0xff] %v2343_v57  ;;  %v2360_v13 = vmul.f32 %v2272_v46, %v2121_v2  ;;  %v2372_v56 = vmul.f32 %v2272_v46, %v2125_v3 }
  0xd4   :  { %1041 = vperm.xlu1 %1756, %v951_v39   ;;  %v817_v39 = vrot.slane %v20_v58, %v1871_v12  ;;  %v2321_v58 = vmul.f32 %v2272_v46, %v2112_v61  ;;  %3211 = vst [vmem:[#allocation39_spill] sm:$0xff] %v2397_v21  ;;  %v255_v26 = vmul.f32 %v2272_v46, %v2136_v7 }
  0xd5   :  { %3206 = vst [vmem:[#allocation34_spill] sm:$0xff] %v2372_v56  ;;  %v2415_v21 = vmul.f32 %v2275_v18, %v2139_v9  ;;  %v2443_v57 = vmul.f32 %v2275_v18, %v2143_v10  ;;  %v506_v54 = vmul.f32 %v2290_v25, %v2230_v28 }
  0xd6   :  { %v2263_v48 = vpop.permute.xlu0 %1001  ;;  %v2284_v15 = vrot.slane %v817_v39, %v1871_v12 }
  0xd7   :  { %v2265_v1 = vpop.permute.xlu1 %691  ;;  %3214 = vst [vmem:[#allocation42_spill] sm:$0xff] %v2415_v21  ;;  %v497_v21 = vmul.f32 %v2290_v25, %v2217_v53  ;;  %v2484_v56 = vadd.f32 %v506_v54, %v255_v26  ;;  %v956_v26 = vld [vmem:[%s3128_s2 + $0x98] sm:$0xff] }
  0xd8   :  { %v846_v8 = vmul.f32 %v1896_v19, %v2265_v1  ;;  %1051 = vperm.xlu1 %1756, %v953_v51   ;;  %v2287_v51 = vrot.slane %v821_v47, %v1871_v12  ;;  %v2305_v12 = vrot.slane %v474_v43, %v2024_v41  ;;  %v2317_v47 = vmul.f32 %v1896_v19, %v2108_v60 }
  0xd9   :  { %v2327_v41 = vmul.f32 %v2275_v18, %v2112_v61  ;;  %v2331_v43 = vmul.f32 %v1887_v17, %v2112_v61  ;;  %v2335_v39 = vmul.f32 %v2284_v15, %v2114_v62  ;;  %v2351_v61 = vmul.f32 %v2275_v18, %v2119_v63 }
  0xda   :  { %v2280_v40 = vpop.permute.xlu0 %1011  ;;  %v1134_v20 = vadd.f32 %v2232_v35, %v846_v8  ;;  %v2347_v8 = vmul.f32 %v2272_v46, %v2119_v63  ;;  %v498_v36 = vmul.f32 %v2305_v12, %v2217_v53  ;;  %v2447_v53 = vmul.f32 %v1887_v17, %v2143_v10 }
  0xdb   :  { %3200 = vst [vmem:[#allocation29_spill] sm:$0xff] %v2280_v40  ;;  %v3216_v40 = vmov 2  }
  0xdc   :  { %1056 = vperm.xlu1 %1756, %v954_v24   ;;  %v2292_v0 = vpop.permute.xlu1 %971  ;;  %v2294_v11 = vadd.f32 %v1134_v20, %v595_v49  ;;  %v2309_v24 = vmul.f32 %v2284_v15, %v2108_v60  ;;  %v2313_v20 = vmul.f32 %v2287_v51, %v2108_v60  ;;  %v2339_v60 = vmul.f32 %v2287_v51, %v2114_v62 }
  0xdd   :  { %v2355_v49 = vmul.f32 %v1887_v17, %v2119_v63  ;;  %v2364_v62 = vmul.f32 %v2275_v18, %v2121_v2  ;;  %v246_v2 = vmul.f32 %v2272_v46, %v2127_v4  ;;  %v256_v4 = vmul.f32 %v2275_v18, %v2136_v7  ;;  %3218 = vst [vmem:[#allocation45_spill] sm:$0xff] %v2447_v53 }
  0xde   :  { %3201 = vst [vmem:[#allocation30_spill] sm:$0xff] %v2294_v11  ;;  %v2323_v59 = vpop.permute.xlu0 %1021  ;;  %v502_v11 = vmul.f32 %v2035_v44, %v2223_v55  ;;  %v507_v53 = vmul.f32 %v2305_v12, %v2230_v28 }
  0xdf   :  { %3202 = vst [vmem:[#allocation31_spill] sm:$0xff] %v2323_v59  ;;  %3204 = vst [vmem:[#allocation33_spill] sm:$0xff] %v2355_v49  ;;  %v2379_v59 = vmul.f32 %v2275_v18, %v2125_v3  ;;  %v2401_v3 = vmul.f32 %v1887_v17, %v2134_v6  ;;  %v844_v49 = vmul.f32 %v2284_v15, %v2265_v1 }
  0xe0   :  { %1758 = vset.pattern.permute.xlu1 %v3205_v38  ;;  %v603_v54 = vadd.f32 %v507_v53, %v256_v4 }
  0xe1   :  { %416 = vperm.xlu1 %1758, %v1944_v27   ;;  %v2375_v63 = vpop.permute.xlu1 %695  ;;  %3207 = vst [vmem:[#allocation35_spill] sm:$0xff] %v2379_v59  ;;  %v2393_v27 = vmul.f32 %v2272_v46, %v2134_v6  ;;  %3212 = vst [vmem:[#allocation40_spill] sm:$0xff] %v2401_v3  ;;  %v2419_v6 = vmul.f32 %v1887_v17, %v2139_v9  ;;  %v261_v3 = vmul.f32 %v2272_v46, %v2143_v10 }
  0xe2   :  { %v2389_v52 = vpop.permute.xlu0 %1031  ;;  %v2467_v10 = vmul.f32 %v2272_v46, %v2155_v16  ;;  %v2482_v16 = vadd.f32 %v502_v11, %v2302_v30  ;;  %v513_v30 = vmul.f32 %v2305_v12, %v2236_v23 }
  0xe3   :  { %3209 = vst [vmem:[#allocation37_spill] sm:$0xff] %v2389_v52  ;;  %3210 = vst [vmem:[#allocation38_spill] sm:$0xff] %v2393_v27  ;;  %v257_v52 = vmul.f32 %v1887_v17, %v2136_v7  ;;  %v2411_v27 = vmul.f32 %v2272_v46, %v2139_v9  ;;  %v845_v7 = vmul.f32 %v2287_v51, %v2265_v1 }
  0xe4   :  { %3215 = vst [vmem:[#allocation43_spill] sm:$0xff] %v2419_v6  ;;  %v500_v9 = vmul.f32 %v2290_v25, %v2223_v55  ;;  %v501_v6 = vmul.f32 %v2305_v12, %v2223_v55  ;;  %v2455_v1 = vmul.f32 %v2272_v46, %v2149_v14  ;;  %3222 = vst [vmem:[#allocation49_spill] sm:$0xff] %v2467_v10  ;;  %v955_v55 = vld [vmem:[%s3128_s2 + $0x90] sm:$0xff] }
  0xe5   :  { %3213 = vst [vmem:[#allocation41_spill] sm:$0xff] %v2411_v27  ;;  %1759 = vset.pattern.permute.xlu1 %v3216_v40  ;;  %v2428_v27 = vpop.permute.xlu1 %699  ;;  %v593_v10 = vadd.f32 %v497_v21, %v246_v2  ;;  %v1132_v46 = vadd.f32 %v2232_v35, %v844_v49 }
  0xe6   :  { %759 = vperm.xlu1 %1759, %v1973_v32   ;;  %v2439_v31 = vpop.permute.xlu0 %1046  ;;  %3219 = vst [vmem:[#allocation46_spill] sm:$0xff] %v2455_v1  ;;  %v2459_v32 = vmul.f32 %v2275_v18, %v2149_v14  ;;  %v508_v1 = vmul.f32 %v2035_v44, %v2230_v28  ;;  %v594_v18 = vadd.f32 %v498_v36, %v247_v33 }
  0xe7   :  { %3217 = vst [vmem:[#allocation44_spill] sm:$0xff] %v2439_v31  ;;  %v2463_v31 = vmul.f32 %v1887_v17, %v2149_v14  ;;  %v596_v59 = vadd.f32 %v500_v9, %v249_v45  ;;  %v597_v14 = vadd.f32 %v501_v6, %v250_v50  ;;  %v512_v28 = vmul.f32 %v2290_v25, %v2236_v23 }
  0xe8   :  { %3220 = vst [vmem:[#allocation47_spill] sm:$0xff] %v2459_v32  ;;  %v1133_v32 = vadd.f32 %v2232_v35, %v845_v7  ;;  %v847_v33 = vmul.f32 %v2284_v15, %v2375_v63  ;;  %v848_v45 = vmul.f32 %v2287_v51, %v2375_v63  ;;  %v2498_v50 = vadd.f32 %v508_v1, %v257_v52 }
  0xe9   :  { %3221 = vst [vmem:[#allocation48_spill] sm:$0xff] %v2463_v31  ;;  %v3223_v31 = vmov 0   ;;  %v1228_v9 = vadd.f32 %v1132_v46, %v593_v10  ;;  %v1129_v52 = vadd.f32 %v2292_v0, %v2309_v24 }
  0xea   :  { %1760 = vset.pattern.permute.xlu1 %v3223_v31  ;;  %v2478_v17 = vpop.permute.xlu1 %986  ;;  %v1229_v49 = vadd.f32 %v1133_v32, %v594_v18  ;;  %v1136_v46 = vadd.f32 %v2238_v37, %v848_v45 }
  0xeb   :  { %1061 = vperm.xlu1 %1760, %v955_v55   ;;  %v341_v36 = vpop.permute.xlu0 %340  ;;  %v2509_v55 = vmul.f32 %v2035_v44, %v2236_v23  ;;  %v850_v23 = vmul.f32 %v2284_v15, %v2428_v27 }
  0xec   :  { %v494_v21 = vmul.f32 %v2290_v25, %v341_v36  ;;  %v495_v35 = vmul.f32 %v2305_v12, %v341_v36  ;;  %v496_v11 = vmul.f32 %v2035_v44, %v341_v36  ;;  %v2511_v36 = vadd.f32 %v512_v28, %v261_v3 }
  0xed   :  { %v1325_v24 = vmax.f32 %v1229_v49, 0.0  ;;  %v1138_v32 = vadd.f32 %v2478_v17, %v850_v23  ;;  %v1324_v28 = vmax.f32 %v1228_v9, 0.0  ;;  %v849_v9 = vmul.f32 %v1896_v19, %v2375_v63 }
  0xee   :  { %v590_v2 = vadd.f32 %v494_v21, %v2360_v13  ;;  %v2504_v6 = vadd.f32 %v496_v11, %v2368_v42  ;;  %v591_v7 = vadd.f32 %v495_v35, %v2364_v62  ;;  %v1130_v13 = vadd.f32 %v2292_v0, %v2313_v20 }
  0xef   :  { %1066 = vperm.xlu1 %1760, %v956_v26   ;;  %v2515_v4 = vpop.permute.xlu1 %707  ;;  %v353_v18 = vpop.permute.xlu0 %352  ;;  %v1135_v42 = vadd.f32 %v2238_v37, %v847_v33  ;;  %v851_v33 = vmul.f32 %v2287_v51, %v2428_v27 }
  0xf0   :  { %v503_v62 = vmul.f32 %v2290_v25, %v353_v18  ;;  %v504_v3 = vmul.f32 %v2305_v12, %v353_v18  ;;  %v1226_v53 = vadd.f32 %v1130_v13, %v591_v7  ;;  %v1225_v1 = vadd.f32 %v1129_v52, %v590_v2 }
  0xf1   :  { %v857_v10 = vmul.f32 %v2287_v51, %v2515_v4  ;;  %v1231_v2 = vadd.f32 %v1135_v42, %v596_v59 }
  0xf2   :  { %v599_v20 = vadd.f32 %v503_v62, %v2321_v58  ;;  %v600_v45 = vadd.f32 %v504_v3, %v2327_v41  ;;  %v1322_v35 = vmax.f32 %v1226_v53, 0.0  ;;  %v1321_v11 = vmax.f32 %v1225_v1, 0.0 }
  0xf3   :  { %1761 = vset.pattern.permute.xlu1 %v3205_v38  ;;  %v2533_v21 = vpop.permute.xlu0 %360  ;;  %v1232_v58 = vadd.f32 %v1136_v46, %v597_v14  ;;  %v1139_v41 = vadd.f32 %v2478_v17, %v851_v33  ;;  %v1145_v23 = vadd.f32 %v2250_v22, %v857_v10  ;;  %v609_v53 = vadd.f32 %v513_v30, %v2443_v57 }
  0xf4   :  { %v510_v26 = vmul.f32 %v2305_v12, %v2533_v21  ;;  %424 = vperm.xlu1 %1761, %v1956_v29   ;;  %v2538_v49 = vpop.permute.xlu1 %991  ;;  %v1234_v7 = vadd.f32 %v1138_v32, %v599_v20  ;;  %v1633_v13 = vpack.c.bf16 %v1325_v24, %v1322_v35  ;;  %v509_v62 = vmul.f32 %v2290_v25, %v2533_v21 }
  0xf5   :  { %v1142_v52 = vadd.f32 %v2538_v49, %v2339_v60  ;;  %v1635_v3 = vpack.c.bf16 %v1324_v28, %v1321_v11  ;;  %v1141_v59 = vadd.f32 %v2538_v49, %v2335_v39  ;;  %v1235_v63 = vadd.f32 %v1139_v41, %v600_v45 }
  0xf6   :  { %v606_v29 = vadd.f32 %v510_v26, %v2351_v61  ;;  %1634 = vmatprep.subr.bf16.mxu0 %v1633_v13  ;;  %v1330_v42 = vmax.f32 %v1234_v7, 0.0  ;;  %v856_v60 = vmul.f32 %v2284_v15, %v2515_v4  ;;  %v1328_v24 = vmax.f32 %v1232_v58, 0.0 }
  0xf7   :  { %v369_v14 = vpop.permute.xlu0 %368  ;;  %v1238_v46 = vadd.f32 %v1142_v52, %v603_v54  ;;  %1636 = vmatpush1.bf16.msra.mxu0 %v1635_v3  ;;  %v1327_v1 = vmax.f32 %v1231_v2, 0.0  ;;  %v505_v61 = vmul.f32 %v2035_v44, %v353_v18  ;;  %v1331_v32 = vmax.f32 %v1235_v63, 0.0 }
  0xf8   :  { %1762 = vset.pattern.permute.xlu1 %v3216_v40  ;;  %v1241_v10 = vadd.f32 %v1145_v23, %v606_v29  ;;  %v1137_v54 = vadd.f32 %v2238_v37, %v849_v9  ;;  %v605_v57 = vadd.f32 %v509_v62, %v2347_v8  ;;  %v1237_v11 = vadd.f32 %v1141_v59, %v2484_v56  ;;  %v958_v29 = vld [vmem:[%s3128_s2 + $0xa8] sm:$0xff] }
  0xf9   :  { %767 = vperm.xlu1 %1762, %v1985_v34   ;;  %v2557_v39 = vpop.permute.xlu1 %711  ;;  %v1334_v20 = vmax.f32 %v1238_v46, 0.0  ;;  %v1639_v28 = vpack.c.bf16 %v1330_v42, %v1327_v1  ;;  %v1637_v45 = vpack.c.bf16 %v1331_v32, %v1328_v24  ;;  %v957_v34 = vld [vmem:[%s3128_s2 + $0xa0] sm:$0xff]  ;;  %v2573_v37 = vmul.f32 %v2290_v25, %v2248_v5  ;;  %v3225_v42 = vld [vmem:[#allocation35_spill] sm:$0xff] }
  0xfa   :  { %v859_v30 = vmul.f32 %v2284_v15, %v2557_v39  ;;  %v860_v33 = vmul.f32 %v2287_v51, %v2557_v39  ;;  %v1337_v35 = vmax.f32 %v1241_v10, 0.0  ;;  %v852_v8 = vmul.f32 %v1896_v19, %v2428_v27 }
  0xfb   :  { %v2565_v18 = vpop.permute.xlu0 %376  ;;  %v515_v26 = vmul.f32 %v2290_v25, %v369_v14  ;;  %v516_v58 = vmul.f32 %v2305_v12, %v369_v14  ;;  %v1144_v2 = vadd.f32 %v2250_v22, %v856_v60  ;;  %v601_v7 = vadd.f32 %v505_v61, %v2331_v43  ;;  %1638 = vmatprep.subr.bf16.mxu0 %v1637_v45  ;;  %v3226_v61 = vld [vmem:[#allocation36_spill] sm:$0xff] }
  0xfc   :  { %v1641_v56 = vpack.c.bf16 %v1337_v35, %v1334_v20  ;;  %v517_v41 = vmul.f32 %v2035_v44, %v369_v14  ;;  %v1147_v52 = vadd.f32 %v2263_v48, %v859_v30  ;;  %v1148_v13 = vadd.f32 %v2263_v48, %v860_v33  ;;  %1640 = vmatpush1.bf16.msra.mxu0 %v1639_v28  ;;  %v3224_v14 = vld [vmem:[#allocation34_spill] sm:$0xff] }
  0xfd   :  { %1763 = vset.pattern.permute.xlu1 %v3223_v31  ;;  %v716_v9 = vpop.permute.xlu1 %715  ;;  %v1131_v27 = vadd.f32 %v2292_v0, %v2317_v47  ;;  %v1240_v43 = vadd.f32 %v1144_v2, %v605_v57  ;;  %v1333_v62 = vmax.f32 %v1237_v11, 0.0  ;;  %v1233_v3 = vadd.f32 %v1137_v54, %v2482_v16 }
  0xfe   :  { %1071 = vperm.xlu1 %1763, %v957_v34   ;;  %1642 = vmatprep.subr.bf16.mxu0 %v1641_v56  ;;  %v1140_v59 = vadd.f32 %v2478_v17, %v852_v8  ;;  %v611_v63 = vadd.f32 %v515_v26, %v3224_v14  ;;  %v612_v46 = vadd.f32 %v516_v58, %v3225_v42  ;;  %v3227_v34 = vld [vmem:[#allocation30_spill] sm:$0xff]  ;;  %v3228_v58 = vld [vmem:[#allocation32_spill] sm:$0xff] }
  0xff   :  { %v2587_v23 = vpop.permute.xlu0 %384  ;;  %v862_v60 = vmul.f32 %v2284_v15, %v716_v9  ;;  %v1336_v0 = vmax.f32 %v1240_v43, 0.0  ;;  %v863_v47 = vmul.f32 %v2287_v51, %v716_v9  ;;  %v864_v24 = vmul.f32 %v1896_v19, %v716_v9 }
 0x100   :  { %v1227_v1 = vadd.f32 %v1131_v27, %v2504_v6  ;;  %v613_v32 = vadd.f32 %v517_v41, %v3226_v61  ;;  %v1244_v16 = vadd.f32 %v1148_v13, %v609_v53  ;;  %v1243_v17 = vadd.f32 %v1147_v52, %v2511_v36  ;;  %v3233_v61 = vld [vmem:[#allocation28_spill] sm:$0xff] }
 0x101   :  { %v1236_v20 = vadd.f32 %v1140_v59, %v601_v7  ;;  %v1643_v54 = vpack.c.bf16 %v1336_v0, %v1333_v62  ;;  %v519_v45 = vmul.f32 %v2305_v12, %v2248_v5  ;;  %v511_v6 = vmul.f32 %v2035_v44, %v2533_v21  ;;  %v3229_v21 = vld [vmem:[#allocation3_spill] sm:$0xff]  ;;  %v3230_v59 = vld [vmem:[#allocation33_spill] sm:$0xff] }
 0x102   :  { %1076 = vperm.xlu1 %1763, %v958_v29   ;;  %v1007_v10 = vpop.permute.xlu1 %1006  ;;  %v1326_v35 = vmax.f32 %v3227_v34, 0.0  ;;  %v1329_v11 = vmax.f32 %v1233_v3, 0.0  ;;  %v1323_v26 = vmax.f32 %v1227_v1, 0.0  ;;  %v1143_v2 = vadd.f32 %v2538_v49, %v3228_v58  ;;  %v3232_v1 = vld [vmem:[#allocation8_spill] sm:$0xff] }
 0x103   :  { %v1150_v57 = vadd.f32 %v1007_v10, %v862_v60  ;;  %v1151_v30 = vadd.f32 %v1007_v10, %v863_v47  ;;  %v1152_v28 = vadd.f32 %v1007_v10, %v864_v24  ;;  %v2602_v33 = vpop.permute.xlu0 %392  ;;  %1644 = vmatpush1.bf16.msra.mxu0 %v1643_v54  ;;  %v861_v7 = vmul.f32 %v1896_v19, %v2557_v39  ;;  %v3231_v47 = vld [vmem:[#allocation29_spill] sm:$0xff] }
 0x104   :  { %v1340_v9 = vmax.f32 %v1244_v16, 0.0  ;;  %v1339_v56 = vmax.f32 %v1243_v17, 0.0  ;;  %v2619_v43 = vpack.c.bf16 %v1326_v35, %v1323_v26  ;;  %v1332_v62 = vmax.f32 %v1236_v20, 0.0  ;;  %v3234_v10 = vld [vmem:[#allocation45_spill] sm:$0xff]  ;;  %v3237_v35 = vld [vmem:[#allocation47_spill] sm:$0xff] }
 0x105   :  { %v1246_v53 = vadd.f32 %v1150_v57, %v611_v63  ;;  %v1247_v8 = vadd.f32 %v1151_v30, %v612_v46  ;;  %v2609_v36 = vadd.f32 %v1152_v28, %v613_v32  ;;  %v858_v49 = vmul.f32 %v1896_v19, %v2515_v4  ;;  %v3235_v28 = vld [vmem:[#allocation5_spill] sm:$0xff] }
 0x106   :  { %1764 = vset.pattern.permute.xlu1 %v3205_v38  ;;  %v607_v14 = vadd.f32 %v511_v6, %v3230_v59  ;;  %v521_v63 = vmul.f32 %v2290_v25, %v2565_v18  ;;  %v1149_v60 = vadd.f32 %v2263_v48, %v861_v7  ;;  %v522_v0 = vmul.f32 %v2305_v12, %v2565_v18  ;;  %v3236_v6 = vld [vmem:[#allocation46_spill] sm:$0xff] }
 0x107   :  { %432 = vperm.xlu1 %1764, %v3229_v21   ;;  %v720_v41 = vpop.permute.xlu1 %719  ;;  %v2617_v52 = vpop.permute.xlu0 %400  ;;  %v1343_v13 = vmax.f32 %v1247_v8, 0.0  ;;  %v1342_v27 = vmax.f32 %v1246_v53, 0.0  ;;  %v1239_v24 = vadd.f32 %v1143_v2, %v2498_v50  ;;  %v2636_v32 = vmul.f32 %v3233_v61, %v3232_v1  ;;  %v3238_v53 = vld [vmem:[#allocation38_spill] sm:$0xff]  ;;  %v3240_v21 = vld [vmem:[#allocation40_spill] sm:$0xff] }
 0x108   :  { %v865_v29 = vmul.f32 %v2284_v15, %v720_v41  ;;  %v866_v39 = vmul.f32 %v2287_v51, %v720_v41  ;;  %v867_v3 = vmul.f32 %v1896_v19, %v720_v41  ;;  %v610_v16 = vadd.f32 %v2509_v55, %v3234_v10 }
 0x109   :  { %v1645_v42 = vpack.c.bf16 %v1343_v13, %v1340_v9  ;;  %v1647_v46 = vpack.c.bf16 %v1342_v27, %v1339_v56  ;;  %v2643_v48 = vpack.c.bf16 %v1332_v62, %v1329_v11  ;;  %v1146_v54 = vadd.f32 %v2250_v22, %v858_v49  ;;  %v3239_v22 = vld [vmem:[#allocation39_spill] sm:$0xff] }
 0x10a   :  { %v1155_v4 = vadd.f32 %v3231_v47, %v867_v3  ;;  %v523_v50 = vmul.f32 %v2035_v44, %v2565_v18  ;;  %v1153_v57 = vadd.f32 %v3231_v47, %v865_v29  ;;  %v1154_v30 = vadd.f32 %v3231_v47, %v866_v39  ;;  %v959_v18 = vld [vmem:[%s3128_s2 + $0xb0] sm:$0xff]  ;;  %v960_v47 = vld [vmem:[%s3128_s2 + $0xb8] sm:$0xff] }
 0x10b   :  { %1765 = vset.pattern.permute.xlu1 %v3216_v40  ;;  %v724_v17 = vpop.permute.xlu1 %723  ;;  %v2641_v20 = vpop.permute.xlu0 %404  ;;  %1646 = vmatprep.subr.bf16.mxu0 %v1645_v42  ;;  %v520_v55 = vmul.f32 %v2035_v44, %v2248_v5  ;;  %v614_v34 = vadd.f32 %v2573_v37, %v3236_v6  ;;  %v615_v11 = vadd.f32 %v519_v45, %v3237_v35  ;;  %v1335_v2 = vmax.f32 %v1239_v24, 0.0  ;;  %v3242_v42 = vld [vmem:[#allocation20_spill] sm:$0xff] }
 0x10c   :  { %775 = vperm.xlu1 %1765, %v3235_v28   ;;  %v617_v8 = vadd.f32 %v521_v63, %v3238_v53  ;;  %1648 = vmatpush1.bf16.msra.mxu0 %v1647_v46  ;;  %v618_v26 = vadd.f32 %v522_v0, %v3239_v22  ;;  %v1242_v58 = vadd.f32 %v1146_v54, %v607_v14  ;;  %v1344_v45 = vmax.f32 %v2609_v36, 0.0  ;;  %v3241_v14 = vld [vmem:[#allocation2_spill] sm:$0xff]  ;;  %v3243_v46 = vld [vmem:[#allocation27_spill] sm:$0xff]  ;;  %v3244_v36 = vld [vmem:[#allocation48_spill] sm:$0xff] }
 0x10d   :  { %v1245_v7 = vadd.f32 %v1149_v60, %v610_v16  ;;  %v868_v9 = vmul.f32 %v2284_v15, %v724_v17  ;;  %v869_v5 = vmul.f32 %v2287_v51, %v724_v17  ;;  %v870_v37 = vmul.f32 %v1896_v19, %v724_v17 }
 0x10e   :  { %v619_v41 = vadd.f32 %v523_v50, %v3240_v21  ;;  %v1250_v27 = vadd.f32 %v1154_v30, %v615_v11  ;;  %v1249_v62 = vadd.f32 %v1153_v57, %v614_v34  ;;  %v1338_v49 = vmax.f32 %v1242_v58, 0.0  ;;  %v3245_v30 = vld [vmem:[#allocation22_spill] sm:$0xff] }
 0x10f   :  { %v2664_v56 = vpop.permute.xlu0 %412  ;;  %v1341_v59 = vmax.f32 %v1245_v7, 0.0  ;;  %v275_v63 = vmul.f32 %v3241_v14, %v3232_v1  ;;  %v309_v60 = vmul.f32 %v3243_v46, %v3242_v42  ;;  %v616_v0 = vadd.f32 %v520_v55, %v3244_v36 }
 0x110   :  { %1766 = vset.pattern.permute.xlu1 %v3223_v31  ;;  %v1017_v13 = vpop.permute.xlu1 %1016  ;;  %v2677_v24 = vpack.c.bf16 %v1338_v49, %v1335_v2  ;;  %v310_v1 = vmul.f32 %v3233_v61, %v3242_v42  ;;  %v311_v57 = vmul.f32 %v3241_v14, %v3242_v42  ;;  %v315_v28 = vmul.f32 %v3243_v46, %v3245_v30 }
 0x111   :  { %v1156_v29 = vadd.f32 %v1017_v13, %v868_v9  ;;  %v1157_v39 = vadd.f32 %v1017_v13, %v869_v5  ;;  %v1158_v3 = vadd.f32 %v1017_v13, %v870_v37  ;;  %1081 = vperm.xlu1 %1766, %v959_v18   ;;  %v2681_v50 = vpack.c.bf16 %v1344_v45, %v1341_v59  ;;  %v3247_v59 = vld [vmem:[#allocation4_spill] sm:$0xff] }
 0x112   :  { %v1251_v55 = vadd.f32 %v1155_v4, %v616_v0  ;;  %v1346_v34 = vmax.f32 %v1250_v27, 0.0  ;;  %v1345_v11 = vmax.f32 %v1249_v62, 0.0  ;;  %v317_v22 = vmul.f32 %v3241_v14, %v3245_v30 }
 0x113   :  { %v1252_v10 = vadd.f32 %v1156_v29, %v617_v8  ;;  %v1253_v16 = vadd.f32 %v1157_v39, %v618_v26  ;;  %v1254_v17 = vadd.f32 %v1158_v3, %v619_v41  ;;  %v2679_v54 = vpop.permute.xlu0 %420  ;;  %v316_v8 = vmul.f32 %v3233_v61, %v3245_v30  ;;  %v3246_v26 = vld [vmem:[#allocation24_spill] sm:$0xff] }
 0x114   :  { %v321_v18 = vmul.f32 %v3243_v46, %v3246_v26  ;;  %v322_v58 = vmul.f32 %v3233_v61, %v3246_v26  ;;  %v323_v37 = vmul.f32 %v3241_v14, %v3246_v26  ;;  %v1347_v49 = vmax.f32 %v1251_v55, 0.0  ;;  %v3250_v55 = vld [vmem:[#allocation31_spill] sm:$0xff] }
 0x115   :  { %1086 = vperm.xlu1 %1766, %v960_v47   ;;  %v381_v6 = vpop.permute.xlu1 %380  ;;  %v1349_v35 = vmax.f32 %v1253_v16, 0.0  ;;  %v1348_v53 = vmax.f32 %v1252_v10, 0.0  ;;  %v1350_v5 = vmax.f32 %v1254_v17, 0.0  ;;  %v3249_v16 = vld [vmem:[#allocation25_spill] sm:$0xff] }
 0x116   :  { %v526_v4 = vmul.f32 %v2035_v44, %v381_v6  ;;  %v524_v13 = vmul.f32 %v2290_v25, %v381_v6  ;;  %v525_v27 = vmul.f32 %v2305_v12, %v381_v6 }
 0x117   :  { %v429_v2 = vpop.permute.xlu0 %428  ;;  %v1649_v7 = vpack.c.bf16 %v1349_v35, %v1346_v34  ;;  %v1651_v9 = vpack.c.bf16 %v1348_v53, %v1345_v11  ;;  %v2716_v10 = vpack.c.bf16 %v1350_v5, %v1347_v49  ;;  %v3251_v11 = vld [vmem:[#allocation49_spill] sm:$0xff]  ;;  %v529_v5 = vmul.f32 %v2035_v44, %v2587_v23 }
 0x118   :  { %v560_v45 = vmul.f32 %v2290_v25, %v429_v2  ;;  %v561_v21 = vmul.f32 %v2305_v12, %v429_v2  ;;  %v562_v41 = vmul.f32 %v2035_v44, %v429_v2  ;;  %v622_v62 = vadd.f32 %v526_v4, %v275_v63 }
 0x119   :  { %1767 = vset.pattern.permute.xlu1 %v3205_v38  ;;  %1650 = vmatprep.subr.bf16.mxu0 %v1649_v7  ;;  %3248 = vst [vmem:[#allocation34_spill] sm:$0xff] %v2716_v10  ;;  %v621_v30 = vadd.f32 %v525_v27, %v2636_v32  ;;  %v620_v53 = vadd.f32 %v524_v13, %v3251_v11 }
 0x11a   :  { %v2706_v29 = vadd.f32 %v560_v45, %v309_v60  ;;  %v2708_v39 = vadd.f32 %v561_v21, %v310_v1  ;;  %v2710_v3 = vadd.f32 %v562_v41, %v311_v57  ;;  %440 = vperm.xlu1 %1767, %v3247_v59   ;;  %v728_v42 = vpop.permute.xlu1 %727  ;;  %1652 = vmatpush1.bf16.msra.mxu0 %v1651_v9  ;;  %v961_v59 = vld [vmem:[%s3128_s2 + $0xc0] sm:$0xff] }
 0x11b   :  { %v871_v36 = vmul.f32 %v2284_v15, %v728_v42  ;;  %v872_v0 = vmul.f32 %v2287_v51, %v728_v42  ;;  %v873_v63 = vmul.f32 %v1896_v19, %v728_v42  ;;  %v437_v47 = vpop.permute.xlu0 %436  ;;  %v327_v60 = vmul.f32 %v3243_v46, %v3249_v16 }
 0x11c   :  { %v566_v17 = vmul.f32 %v2290_v25, %v437_v47  ;;  %v567_v1 = vmul.f32 %v2305_v12, %v437_v47  ;;  %v568_v57 = vmul.f32 %v2035_v44, %v437_v47  ;;  %v527_v32 = vmul.f32 %v2290_v25, %v2587_v23 }
 0x11d   :  { %v1159_v6 = vadd.f32 %v3250_v55, %v871_v36  ;;  %v1160_v34 = vadd.f32 %v3250_v55, %v872_v0  ;;  %v1161_v35 = vadd.f32 %v3250_v55, %v873_v63  ;;  %v528_v9 = vmul.f32 %v2305_v12, %v2587_v23 }
 0x11e   :  { %v2728_v26 = vadd.f32 %v566_v17, %v315_v28  ;;  %v2730_v4 = vadd.f32 %v567_v1, %v316_v8  ;;  %v2732_v2 = vadd.f32 %v568_v57, %v317_v22  ;;  %1768 = vset.pattern.permute.xlu1 %v3216_v40  ;;  %v732_v7 = vpop.permute.xlu1 %731  ;;  %v1781_v28 = vld [vmem:[%s3126_s1 + $0xc0] sm:$0xff]  ;;  %v328_v27 = vmul.f32 %v3233_v61, %v3249_v16  ;;  %v3258_v1 = vld [vmem:[#allocation41_spill] sm:$0xff] }
 0x11f   :  { %783 = vperm.xlu1 %1768, %v1781_v28   ;;  %v445_v8 = vpop.permute.xlu0 %444  ;;  %v1256_v22 = vadd.f32 %v1160_v34, %v621_v30  ;;  %v1255_v13 = vadd.f32 %v1159_v6, %v620_v53  ;;  %v874_v49 = vmul.f32 %v2284_v15, %v732_v7  ;;  %v875_v23 = vmul.f32 %v2287_v51, %v732_v7  ;;  %v3259_v30 = vld [vmem:[#allocation42_spill] sm:$0xff]  ;;  %v3260_v6 = vld [vmem:[#allocation43_spill] sm:$0xff] }
 0x120   :  { %3252 = vst [vmem:[#allocation35_spill] sm:$0xff] %v2728_v26  ;;  %3253 = vst [vmem:[#allocation36_spill] sm:$0xff] %v2730_v4  ;;  %v572_v45 = vmul.f32 %v2290_v25, %v445_v8  ;;  %v573_v21 = vmul.f32 %v2305_v12, %v445_v8  ;;  %v574_v41 = vmul.f32 %v2035_v44, %v445_v8 }
 0x121   :  { %3254 = vst [vmem:[#allocation30_spill] sm:$0xff] %v2732_v2  ;;  %v1257_v42 = vadd.f32 %v1161_v35, %v622_v62  ;;  %v876_v36 = vmul.f32 %v1896_v19, %v732_v7  ;;  %v329_v17 = vmul.f32 %v3241_v14, %v3249_v16  ;;  %v623_v57 = vadd.f32 %v527_v32, %v3258_v1 }
 0x122   :  { %v2755_v0 = vadd.f32 %v572_v45, %v321_v18  ;;  %v2757_v63 = vadd.f32 %v573_v21, %v322_v58  ;;  %v2759_v47 = vadd.f32 %v574_v41, %v323_v37  ;;  %v624_v55 = vadd.f32 %v528_v9, %v3259_v30  ;;  %v3261_v37 = vld [vmem:[#allocation26_spill] sm:$0xff] }
 0x123   :  { %v625_v34 = vadd.f32 %v529_v5, %v3260_v6  ;;  %1769 = vset.pattern.permute.xlu1 %v3223_v31  ;;  %v1027_v62 = vpop.permute.xlu1 %1026  ;;  %v453_v35 = vpop.permute.xlu0 %452  ;;  %v333_v7 = vmul.f32 %v3243_v46, %v3261_v37  ;;  %v334_v16 = vmul.f32 %v3233_v61, %v3261_v37  ;;  %v962_v5 = vld [vmem:[%s3128_s2 + $0xc8] sm:$0xff]  ;;  %v335_v41 = vmul.f32 %v3241_v14, %v3261_v37 }
 0x124   :  { %3255 = vst [vmem:[#allocation32_spill] sm:$0xff] %v2755_v0  ;;  %3256 = vst [vmem:[#allocation3_spill] sm:$0xff] %v2757_v63  ;;  %v1162_v11 = vadd.f32 %v1027_v62, %v874_v49  ;;  %v1163_v18 = vadd.f32 %v1027_v62, %v875_v23  ;;  %v1164_v53 = vadd.f32 %v1027_v62, %v876_v36  ;;  %1091 = vperm.xlu1 %1769, %v961_v59  }
 0x125   :  { %3257 = vst [vmem:[#allocation33_spill] sm:$0xff] %v2759_v47  ;;  %v578_v58 = vmul.f32 %v2290_v25, %v453_v35  ;;  %v579_v32 = vmul.f32 %v2305_v12, %v453_v35  ;;  %v580_v9 = vmul.f32 %v2035_v44, %v453_v35  ;;  %v1352_v36 = vmax.f32 %v1256_v22, 0.0 }
 0x126   :  { %v1258_v28 = vadd.f32 %v1162_v11, %v623_v57  ;;  %v1259_v8 = vadd.f32 %v1163_v18, %v624_v55  ;;  %v1260_v45 = vadd.f32 %v1164_v53, %v625_v34  ;;  %v1353_v37 = vmax.f32 %v1257_v42, 0.0 }
 0x127   :  { %v2777_v21 = vadd.f32 %v578_v58, %v327_v60  ;;  %v2781_v49 = vadd.f32 %v579_v32, %v328_v27  ;;  %v2783_v23 = vadd.f32 %v580_v9, %v329_v17  ;;  %v461_v59 = vpop.permute.xlu0 %460  ;;  %v3265_v60 = vld [vmem:[#allocation10_spill] sm:$0xff]  ;;  %v1351_v27 = vmax.f32 %v1255_v13, 0.0  ;;  %v1782_v9 = vld [vmem:[%s3126_s1 + $0xd8] sm:$0xff] }
 0x128   :  { %v584_v1 = vmul.f32 %v2290_v25, %v461_v59  ;;  %v585_v30 = vmul.f32 %v2305_v12, %v461_v59  ;;  %v586_v6 = vmul.f32 %v2035_v44, %v461_v59  ;;  %1096 = vperm.xlu1 %1769, %v962_v5   ;;  %v389_v57 = vpop.permute.xlu1 %388  ;;  %v1355_v55 = vmax.f32 %v1259_v8, 0.0 }
 0x129   :  { %3262 = vst [vmem:[#allocation29_spill] sm:$0xff] %v2777_v21  ;;  %3263 = vst [vmem:[#allocation8_spill] sm:$0xff] %v2781_v49  ;;  %v281_v34 = vmul.f32 %v3241_v14, %v3265_v60  ;;  %v532_v62 = vmul.f32 %v2035_v44, %v389_v57  ;;  %v1354_v35 = vmax.f32 %v1258_v28, 0.0  ;;  %v1356_v32 = vmax.f32 %v1260_v45, 0.0 }
 0x12a   :  { %3264 = vst [vmem:[#allocation28_spill] sm:$0xff] %v2783_v23  ;;  %v2791_v17 = vadd.f32 %v584_v1, %v333_v7  ;;  %v2793_v11 = vadd.f32 %v585_v30, %v334_v16  ;;  %v2795_v22 = vadd.f32 %v586_v6, %v335_v41  ;;  %v1653_v18 = vpack.c.bf16 %v1355_v55, %v1352_v36  ;;  %v3270_v41 = vld [vmem:[#allocation37_spill] sm:$0xff] }
 0x12b   :  { %v628_v53 = vadd.f32 %v532_v62, %v281_v34  ;;  %v1655_v58 = vpack.c.bf16 %v1354_v35, %v1351_v27  ;;  %v2803_v5 = vpack.c.bf16 %v1356_v32, %v1353_v37  ;;  %v531_v8 = vmul.f32 %v2305_v12, %v389_v57  ;;  %v1783_v34 = vld [vmem:[%s3126_s1 + $0xd0] sm:$0xff]  ;;  %v3271_v35 = vld [vmem:[#allocation6_spill] sm:$0xff] }
 0x12c   :  { %3266 = vst [vmem:[#allocation45_spill] sm:$0xff] %v2791_v17  ;;  %3267 = vst [vmem:[#allocation5_spill] sm:$0xff] %v2793_v11  ;;  %1770 = vset.pattern.permute.xlu1 %v3205_v38  ;;  %1654 = vmatprep.subr.bf16.mxu0 %v1653_v18  ;;  %v280_v45 = vmul.f32 %v3233_v61, %v3265_v60  ;;  %v530_v59 = vmul.f32 %v2290_v25, %v389_v57  ;;  %v963_v32 = vld [vmem:[%s3128_s2 + $0xd0] sm:$0xff] }
 0x12d   :  { %3268 = vst [vmem:[#allocation46_spill] sm:$0xff] %v2795_v22  ;;  %448 = vperm.xlu1 %1770, %v1782_v9   ;;  %v736_v13 = vpop.permute.xlu1 %735  ;;  %1656 = vmatpush1.bf16.msra.mxu0 %v1655_v58  ;;  %3269 = vst [vmem:[#allocation47_spill] sm:$0xff] %v2803_v5  ;;  %v533_v1 = vmul.f32 %v2290_v25, %v2602_v33  ;;  %v534_v30 = vmul.f32 %v2305_v12, %v2602_v33 }
 0x12e   :  { %v878_v7 = vmul.f32 %v2287_v51, %v736_v13  ;;  %v879_v16 = vmul.f32 %v1896_v19, %v736_v13  ;;  %v877_v28 = vmul.f32 %v2284_v15, %v736_v13  ;;  %v535_v6 = vmul.f32 %v2035_v44, %v2602_v33 }
 0x12f   :  { %v279_v57 = vmul.f32 %v3243_v46, %v3265_v60  ;;  %v282_v18 = vmul.f32 %v3243_v46, %v3271_v35  ;;  %v283_v58 = vmul.f32 %v3233_v61, %v3271_v35  ;;  %v284_v33 = vmul.f32 %v3241_v14, %v3271_v35 }
 0x130   :  { %v1167_v42 = vadd.f32 %v3270_v41, %v879_v16  ;;  %v1166_v55 = vadd.f32 %v3270_v41, %v878_v7  ;;  %v1165_v62 = vadd.f32 %v3270_v41, %v877_v28  ;;  %v627_v37 = vadd.f32 %v531_v8, %v280_v45 }
 0x131   :  { %1771 = vset.pattern.permute.xlu1 %v3216_v40  ;;  %v740_v36 = vpop.permute.xlu1 %739  ;;  %v626_v9 = vadd.f32 %v530_v59, %v279_v57  ;;  %v629_v7 = vadd.f32 %v533_v1, %v282_v18  ;;  %v630_v16 = vadd.f32 %v534_v30, %v283_v58  ;;  %v631_v28 = vadd.f32 %v535_v6, %v284_v33  ;;  %v964_v59 = vld [vmem:[%s3128_s2 + $0xd8] sm:$0xff] }
 0x132   :  { %791 = vperm.xlu1 %1771, %v1783_v34   ;;  %v1263_v27 = vadd.f32 %v1167_v42, %v628_v53  ;;  %v880_v60 = vmul.f32 %v2284_v15, %v740_v36  ;;  %v881_v13 = vmul.f32 %v2287_v51, %v740_v36  ;;  %v882_v53 = vmul.f32 %v1896_v19, %v740_v36 }
 0x133   :  { %v1262_v42 = vadd.f32 %v1166_v55, %v627_v37  ;;  %v1261_v35 = vadd.f32 %v1165_v62, %v626_v9  ;;  %v3272_v55 = vld [vmem:[#allocation12_spill] sm:$0xff]  ;;  %v544_v21 = vmul.f32 %v2035_v44, %v2641_v20 }
 0x134   :  { %v287_v33 = vmul.f32 %v3241_v14, %v3272_v55  ;;  %v1359_v9 = vmax.f32 %v1263_v27, 0.0  ;;  %v541_v27 = vmul.f32 %v2035_v44, %v2617_v52 }
 0x135   :  { %v1358_v36 = vmax.f32 %v1262_v42, 0.0  ;;  %v1357_v6 = vmax.f32 %v1261_v35, 0.0  ;;  %v3275_v42 = vld [vmem:[#allocation44_spill] sm:$0xff] }
 0x136   :  { %1772 = vset.pattern.permute.xlu1 %v3223_v31  ;;  %v1037_v41 = vpop.permute.xlu1 %1036 }
 0x137   :  { %v1168_v34 = vadd.f32 %v1037_v41, %v880_v60  ;;  %v1169_v8 = vadd.f32 %v1037_v41, %v881_v13  ;;  %v1170_v45 = vadd.f32 %v1037_v41, %v882_v53  ;;  %1101 = vperm.xlu1 %1772, %v963_v32  }
 0x139   :  { %v1264_v57 = vadd.f32 %v1168_v34, %v629_v7  ;;  %v1265_v17 = vadd.f32 %v1169_v8, %v630_v16  ;;  %v1266_v22 = vadd.f32 %v1170_v45, %v631_v28  ;;  %v1785_v16 = vld [vmem:[%s3126_s1 + $0xe0] sm:$0xff]  ;;  %v3274_v28 = vld [vmem:[#allocation7_spill] sm:$0xff] }
 0x13a   :  { %v290_v41 = vmul.f32 %v3241_v14, %v3274_v28  ;;  %v965_v8 = vld [vmem:[%s3128_s2 + $0xe0] sm:$0xff] }
 0x13b   :  { %1106 = vperm.xlu1 %1772, %v964_v59   ;;  %v397_v1 = vpop.permute.xlu1 %396  ;;  %v1361_v30 = vmax.f32 %v1265_v17, 0.0  ;;  %v1360_v18 = vmax.f32 %v1264_v57, 0.0  ;;  %v1362_v58 = vmax.f32 %v1266_v22, 0.0  ;;  %v1784_v17 = vld [vmem:[%s3126_s1 + $0xe8] sm:$0xff]  ;;  %v539_v57 = vmul.f32 %v2290_v25, %v2617_v52 }
 0x13c   :  { %v538_v37 = vmul.f32 %v2035_v44, %v397_v1  ;;  %v637_v45 = vadd.f32 %v541_v27, %v290_v41  ;;  %v752_v41 = vpop.permute.xlu0 %751 }
 0x13d   :  { %v1657_v62 = vpack.c.bf16 %v1361_v30, %v1358_v36  ;;  %v1659_v32 = vpack.c.bf16 %v1360_v18, %v1357_v6  ;;  %v2847_v13 = vpack.c.bf16 %v1362_v58, %v1359_v9  ;;  %v540_v36 = vmul.f32 %v2305_v12, %v2617_v52  ;;  %v966_v6 = vld [vmem:[%s3128_s2 + $0xe8] sm:$0xff] }
 0x13e   :  { %v2844_v60 = vadd.f32 %v538_v37, %v287_v33  ;;  %v288_v58 = vmul.f32 %v3243_v46, %v3274_v28  ;;  %v289_v33 = vmul.f32 %v3233_v61, %v3274_v28  ;;  %v3276_v37 = vld [vmem:[#allocation9_spill] sm:$0xff]  ;;  %v536_v9 = vmul.f32 %v2290_v25, %v397_v1 }
 0x13f   :  { %1773 = vset.pattern.permute.xlu1 %v3205_v38  ;;  %1658 = vmatprep.subr.bf16.mxu0 %v1657_v62  ;;  %3273 = vst [vmem:[#allocation38_spill] sm:$0xff] %v2847_v13  ;;  %v294_v62 = vmul.f32 %v3243_v46, %v3276_v37  ;;  %v295_v52 = vmul.f32 %v3233_v61, %v3276_v37 }
 0x140   :  { %456 = vperm.xlu1 %1773, %v1784_v17   ;;  %v744_v22 = vpop.permute.xlu1 %743  ;;  %1660 = vmatpush1.bf16.msra.mxu0 %v1659_v32  ;;  %v285_v32 = vmul.f32 %v3243_v46, %v3272_v55  ;;  %v286_v17 = vmul.f32 %v3233_v61, %v3272_v55  ;;  %v542_v55 = vmul.f32 %v2290_v25, %v2641_v20 }
 0x141   :  { %v543_v13 = vmul.f32 %v2305_v12, %v2641_v20  ;;  %v889_v23 = vmul.f32 %v2284_v15, %v752_v41 }
 0x144   :  { %1774 = vset.pattern.permute.xlu1 %v3216_v40  ;;  %v748_v53 = vpop.permute.xlu1 %747 }
 0x145   :  { %v888_v7 = vmul.f32 %v1896_v19, %v748_v53  ;;  %799 = vperm.xlu1 %1774, %v1785_v16   ;;  %v887_v59 = vmul.f32 %v2287_v51, %v748_v53  ;;  %v886_v30 = vmul.f32 %v2284_v15, %v748_v53  ;;  %v3277_v53 = vld [vmem:[#allocation14_spill] sm:$0xff] }
 0x146   :  { %v291_v27 = vmul.f32 %v3243_v46, %v3277_v53 }
 0x147   :  { %v1176_v34 = vadd.f32 %v3275_v42, %v888_v7  ;;  %v292_v7 = vmul.f32 %v3233_v61, %v3277_v53  ;;  %v1175_v16 = vadd.f32 %v3275_v42, %v887_v59  ;;  %v1174_v11 = vadd.f32 %v3275_v42, %v886_v30 }
 0x148   :  { %v537_v59 = vmul.f32 %v2305_v12, %v397_v1  ;;  %v883_v42 = vmul.f32 %v2284_v15, %v744_v22  ;;  %v885_v30 = vmul.f32 %v1896_v19, %v744_v22 }
 0x149   :  { %1775 = vset.pattern.permute.xlu1 %v3223_v31  ;;  %v409_v35 = vpop.permute.xlu1 %408  ;;  %v2875_v18 = vadd.f32 %v1176_v34, %v637_v45  ;;  %v293_v34 = vmul.f32 %v3241_v14, %v3277_v53  ;;  %v636_v45 = vadd.f32 %v540_v36, %v289_v33  ;;  %v890_v53 = vmul.f32 %v2287_v51, %v752_v41 }
 0x14a   :  { %1111 = vperm.xlu1 %1775, %v965_v8   ;;  %v635_v8 = vadd.f32 %v539_v57, %v288_v58  ;;  %v891_v57 = vmul.f32 %v1896_v19, %v752_v41  ;;  %v884_v36 = vmul.f32 %v2287_v51, %v744_v22  ;;  %v545_v20 = vmul.f32 %v2290_v25, %v409_v35 }
 0x14b   :  { %v1271_v58 = vadd.f32 %v1175_v16, %v636_v45  ;;  %v546_v1 = vmul.f32 %v2305_v12, %v409_v35  ;;  %v547_v33 = vmul.f32 %v2035_v44, %v409_v35  ;;  %v633_v49 = vadd.f32 %v537_v59, %v286_v17 }
 0x14c   :  { %v1270_v41 = vadd.f32 %v1174_v11, %v635_v8  ;;  %v638_v16 = vadd.f32 %v542_v55, %v291_v27  ;;  %v639_v45 = vadd.f32 %v543_v13, %v292_v7  ;;  %v640_v47 = vadd.f32 %v544_v21, %v293_v34  ;;  %v1787_v13 = vld [vmem:[%s3126_s1 + $0xf0] sm:$0xff] }
 0x14d   :  { %v1367_v26 = vmax.f32 %v1271_v58, 0.0  ;;  %v641_v2 = vadd.f32 %v545_v20, %v294_v62  ;;  %v642_v4 = vadd.f32 %v546_v1, %v295_v52  ;;  %v967_v52 = vld [vmem:[%s3128_s2 + $0xf0] sm:$0xff] }
 0x14e   :  { %1116 = vperm.xlu1 %1775, %v966_v6   ;;  %v756_v28 = vpop.permute.xlu1 %755  ;;  %v632_v6 = vadd.f32 %v536_v9, %v285_v32  ;;  %v1786_v32 = vld [vmem:[%s3126_s1 + $0xf8] sm:$0xff]  ;;  %v1366_v17 = vmax.f32 %v1270_v41, 0.0 }
 0x152   :  { %1777 = vset.pattern.permute.xlu1 %v3205_v38  ;;  %v296_v38 = vmul.f32 %v3241_v14, %v3276_v37  ;;  %v894_v37 = vmul.f32 %v1896_v19, %v756_v28 }
 0x153   :  { %464 = vperm.xlu1 %1777, %v1786_v32   ;;  %v1042_v9 = vpop.permute.xlu1 %1041 }
 0x154   :  { %v1171_v5 = vadd.f32 %v1042_v9, %v883_v42  ;;  %v1172_v0 = vadd.f32 %v1042_v9, %v884_v36  ;;  %v1173_v22 = vadd.f32 %v1042_v9, %v885_v30  ;;  %v643_v8 = vadd.f32 %v547_v33, %v296_v38 }
 0x156   :  { %v1267_v63 = vadd.f32 %v1171_v5, %v632_v6  ;;  %v1268_v10 = vadd.f32 %v1172_v0, %v633_v49  ;;  %v1269_v35 = vadd.f32 %v1173_v22, %v2844_v60  ;;  %v892_v0 = vmul.f32 %v2284_v15, %v756_v28  ;;  %v3278_v22 = vld [vmem:[#allocation11_spill] sm:$0xff] }
 0x157   :  { %1778 = vset.pattern.permute.xlu1 %v3216_v40  ;;  %v1052_v11 = vpop.permute.xlu1 %1051  ;;  %v1368_v60 = vmax.f32 %v2875_v18, 0.0  ;;  %v893_v40 = vmul.f32 %v2287_v51, %v756_v28  ;;  %v968_v28 = vld [vmem:[%s3128_s2 + $0xf8] sm:$0xff]  ;;  %v300_v38 = vmul.f32 %v3243_v46, %v3278_v22 }
 0x158   :  { %v1177_v59 = vadd.f32 %v1052_v11, %v889_v23  ;;  %v1178_v42 = vadd.f32 %v1052_v11, %v890_v53  ;;  %v1179_v36 = vadd.f32 %v1052_v11, %v891_v57  ;;  %807 = vperm.xlu1 %1778, %v1787_v13   ;;  %v1364_v21 = vmax.f32 %v1268_v10, 0.0 }
 0x159   :  { %v1363_v49 = vmax.f32 %v1267_v63, 0.0  ;;  %v1365_v5 = vmax.f32 %v1269_v35, 0.0 }
 0x15a   :  { %v1273_v62 = vadd.f32 %v1177_v59, %v638_v16  ;;  %v1661_v23 = vpack.c.bf16 %v1367_v26, %v1364_v21  ;;  %v1274_v27 = vadd.f32 %v1178_v42, %v639_v45  ;;  %v1275_v10 = vadd.f32 %v1179_v36, %v640_v47  ;;  %v3279_v45 = vld [vmem:[#allocation16_spill] sm:$0xff] }
 0x15b   :  { %v1057_v7 = vpop.permute.xlu1 %1056  ;;  %v1663_v34 = vpack.c.bf16 %v1366_v17, %v1363_v49  ;;  %v2932_v55 = vpack.c.bf16 %v1368_v60, %v1365_v5  ;;  %v301_v16 = vmul.f32 %v3233_v61, %v3278_v22  ;;  %v297_v35 = vmul.f32 %v3243_v46, %v3279_v45  ;;  %v764_v17 = vpop.permute.xlu0 %763 }
 0x15c   :  { %v1180_v63 = vadd.f32 %v1057_v7, %v892_v0  ;;  %v1181_v6 = vadd.f32 %v1057_v7, %v893_v40  ;;  %v1182_v53 = vadd.f32 %v1057_v7, %v894_v37  ;;  %1779 = vset.pattern.permute.xlu1 %v3223_v31  ;;  %1662 = vmatprep.subr.bf16.mxu0 %v1661_v23  ;;  %v1370_v30 = vmax.f32 %v1274_v27, 0.0  ;;  %v1418_v27 = vld [vmem:[%s3130_s3 + $0x8] sm:$0xff] }
 0x15d   :  { %1121 = vperm.xlu1 %1779, %v967_v52   ;;  %1664 = vmatpush1.bf16.msra.mxu0 %v1663_v34  ;;  %v1371_v58 = vmax.f32 %v1275_v10, 0.0  ;;  %v1369_v33 = vmax.f32 %v1273_v62, 0.0  ;;  %v298_v11 = vmul.f32 %v3233_v61, %v3279_v45  ;;  %v548_v59 = vmul.f32 %v2290_v25, %v2664_v56 }
 0x15e   :  { %v1276_v18 = vadd.f32 %v1180_v63, %v641_v2  ;;  %v1277_v26 = vadd.f32 %v1181_v6, %v642_v4  ;;  %v1278_v57 = vadd.f32 %v1182_v53, %v643_v8  ;;  %v1422_v2 = vld [vmem:[%s3129_s4 + $0x8] sm:$0xff]  ;;  %v299_v8 = vmul.f32 %v3241_v14, %v3279_v45  ;;  %1497 = vmatprep.mubr.f32.mxu0 %v1418_v27 }
 0x15f   :  { %v550_v42 = vmul.f32 %v2035_v44, %v2664_v56  ;;  %v898_v40 = vmul.f32 %v2284_v15, %v764_v17  ;;  %v899_v37 = vmul.f32 %v2287_v51, %v764_v17  ;;  %v900_v52 = vmul.f32 %v1896_v19, %v764_v17  ;;  %1574 = vmatprep.mubr.f32.mxu1 %v1418_v27 }
 0x160   :  { %v417_v47 = vpop.permute.xlu1 %416  ;;  %v1373_v20 = vmax.f32 %v1277_v26, 0.0  ;;  %v1374_v1 = vmax.f32 %v1278_v57, 0.0  ;;  %v1372_v32 = vmax.f32 %v1276_v18, 0.0  ;;  %v302_v7 = vmul.f32 %v3241_v14, %v3278_v22 }
 0x161   :  { %1126 = vperm.xlu1 %1779, %v968_v28   ;;  %v551_v36 = vmul.f32 %v2290_v25, %v417_v47  ;;  %v552_v49 = vmul.f32 %v2305_v12, %v417_v47  ;;  %v553_v5 = vmul.f32 %v2035_v44, %v417_v47  ;;  %v646_v10 = vadd.f32 %v550_v42, %v299_v8  ;;  %v3280_v8 = vld [vmem:[#allocation13_spill] sm:$0xff] }
 0x162   :  { %v1665_v9 = vpack.c.bf16 %v1373_v20, %v1370_v30  ;;  %v1697_v31 = vpack.c.bf16 %v1374_v1, %v1371_v58  ;;  %v1667_v4 = vpack.c.bf16 %v1372_v32, %v1369_v33  ;;  %v644_v63 = vadd.f32 %v548_v59, %v297_v35 }
 0x163   :  { %v647_v6 = vadd.f32 %v551_v36, %v300_v38  ;;  %v648_v53 = vadd.f32 %v552_v49, %v301_v16  ;;  %v649_v18 = vadd.f32 %v553_v5, %v302_v7  ;;  %v306_v59 = vmul.f32 %v3243_v46, %v3280_v8 }
 0x164   :  { %1666 = vmatprep.subr.bf16.mxu0 %v1665_v9  ;;  %1698 = vmatprep.subr.bf16.mxu1 %v1697_v31  ;;  %v1421_v9 = vld [vmem:[%s3129_s4] sm:$0xff]  ;;  %v555_v49 = vmul.f32 %v2305_v12, %v2679_v54 }
 0x165   :  { %1430 = vperm.xlu1 %1779, %v1422_v2   ;;  %v760_v41 = vpop.permute.xlu1 %759  ;;  %1668 = vmatpush1.bf16.msra.mxu0 %v1667_v4 }
 0x166   :  { %1700 = vmatpush3.bf16.msra.mxu1 %v2619_v43  ;;  %v549_v43 = vmul.f32 %v2305_v12, %v2664_v56  ;;  %v895_v13 = vmul.f32 %v2284_v15, %v760_v41  ;;  %v896_v21 = vmul.f32 %v2287_v51, %v760_v41  ;;  %v897_v0 = vmul.f32 %v1896_v19, %v760_v41 }
 0x167   :  { %1425 = vperm.xlu0 %1780, %v1421_v9  }
 0x168   :  { %v645_v34 = vadd.f32 %v549_v43, %v298_v11  ;;  %v3281_v43 = vld [vmem:[#allocation18_spill] sm:$0xff] }
 0x169   :  { %v303_v42 = vmul.f32 %v3243_v46, %v3281_v43  ;;  %v304_v36 = vmul.f32 %v3233_v61, %v3281_v43 }
 0x16a   :  { %v1062_v60 = vpop.permute.xlu1 %1061 }
 0x16b   :  { %v1183_v62 = vadd.f32 %v1062_v60, %v895_v13  ;;  %v1184_v23 = vadd.f32 %v1062_v60, %v896_v21  ;;  %v1185_v56 = vadd.f32 %v1062_v60, %v897_v0  ;;  %v772_v13 = vpop.permute.xlu0 %771  ;;  %v305_v21 = vmul.f32 %v3241_v14, %v3281_v43 }
 0x16c   :  { %v554_v0 = vmul.f32 %v2290_v25, %v2679_v54  ;;  %v905_v27 = vmul.f32 %v2287_v51, %v772_v13 }
 0x16d   :  { %v1280_v26 = vadd.f32 %v1184_v23, %v645_v34  ;;  %v1281_v28 = vadd.f32 %v1185_v56, %v646_v10  ;;  %v1279_v30 = vadd.f32 %v1183_v62, %v644_v63  ;;  %v906_v10 = vmul.f32 %v1896_v19, %v772_v13 }
 0x16e   :  { %v1067_v57 = vpop.permute.xlu1 %1066  ;;  %v307_v63 = vmul.f32 %v3233_v61, %v3280_v8 }
 0x16f   :  { %v1186_v58 = vadd.f32 %v1067_v57, %v898_v40  ;;  %v1187_v47 = vadd.f32 %v1067_v57, %v899_v37  ;;  %v1188_v20 = vadd.f32 %v1067_v57, %v900_v52  ;;  %v1376_v31 = vmax.f32 %v1280_v26, 0.0 }
 0x170   :  { %v1377_v2 = vmax.f32 %v1281_v28, 0.0  ;;  %v1375_v38 = vmax.f32 %v1279_v30, 0.0  ;;  %v904_v52 = vmul.f32 %v2284_v15, %v772_v13  ;;  %v650_v26 = vadd.f32 %v554_v0, %v303_v42  ;;  %v780_v42 = vpop.permute.xlu0 %779 }
 0x171   :  { %v1282_v1 = vadd.f32 %v1186_v58, %v647_v6  ;;  %v1283_v33 = vadd.f32 %v1187_v47, %v648_v53  ;;  %v1284_v32 = vadd.f32 %v1188_v20, %v649_v18  ;;  %v308_v6 = vmul.f32 %v3241_v14, %v3280_v8 }
 0x172   :  { %v651_v53 = vadd.f32 %v555_v49, %v304_v36  ;;  %v3282_v36 = vld [vmem:[#allocation15_spill] sm:$0xff] }
 0x173   :  { %v425_v4 = vpop.permute.xlu1 %424  ;;  %v1379_v41 = vmax.f32 %v1283_v33, 0.0  ;;  %v1380_v22 = vmax.f32 %v1284_v32, 0.0  ;;  %v1378_v16 = vmax.f32 %v1282_v1, 0.0  ;;  %v312_v13 = vmul.f32 %v3243_v46, %v3282_v36 }
 0x174   :  { %v557_v5 = vmul.f32 %v2290_v25, %v425_v4  ;;  %v558_v62 = vmul.f32 %v2305_v12, %v425_v4  ;;  %v559_v23 = vmul.f32 %v2035_v44, %v425_v4 }
 0x175   :  { %v1669_v45 = vpack.c.bf16 %v1379_v41, %v1376_v31  ;;  %v1701_v35 = vpack.c.bf16 %v1380_v22, %v1377_v2  ;;  %v1671_v11 = vpack.c.bf16 %v1378_v16, %v1375_v38 }
 0x176   :  { %v653_v28 = vadd.f32 %v557_v5, %v306_v59  ;;  %v654_v57 = vadd.f32 %v558_v62, %v307_v63  ;;  %v655_v30 = vadd.f32 %v559_v23, %v308_v6 }
 0x177   :  { %1670 = vmatprep.subr.bf16.mxu0 %v1669_v45  ;;  %1702 = vmatprep.subr.bf16.mxu1 %v1701_v35 }
 0x178   :  { %v768_v17 = vpop.permute.xlu1 %767  ;;  %1672 = vmatpush1.bf16.msra.mxu0 %v1671_v11  ;;  %1704 = vmatpush3.bf16.msra.mxu1 %v2643_v48  ;;  %v556_v48 = vmul.f32 %v2035_v44, %v2679_v54 }
 0x179   :  { %v901_v60 = vmul.f32 %v2284_v15, %v768_v17  ;;  %v902_v40 = vmul.f32 %v2287_v51, %v768_v17  ;;  %v903_v37 = vmul.f32 %v1896_v19, %v768_v17 }
 0x17a   :  { %v652_v18 = vadd.f32 %v556_v48, %v305_v21 }
 0x17d   :  { %v1072_v56 = vpop.permute.xlu1 %1071 }
 0x17e   :  { %v1189_v7 = vadd.f32 %v1072_v56, %v901_v60  ;;  %v1190_v34 = vadd.f32 %v1072_v56, %v902_v40  ;;  %v1191_v54 = vadd.f32 %v1072_v56, %v903_v37  ;;  %v910_v37 = vmul.f32 %v2284_v15, %v780_v42 }
 0x180   :  { %v1286_v58 = vadd.f32 %v1190_v34, %v651_v53  ;;  %v1287_v47 = vadd.f32 %v1191_v54, %v652_v18  ;;  %v1285_v1 = vadd.f32 %v1189_v7, %v650_v26  ;;  %v314_v7 = vmul.f32 %v3241_v14, %v3282_v36 }
 0x181   :  { %v1077_v20 = vpop.permute.xlu1 %1076 }
 0x182   :  { %v1192_v33 = vadd.f32 %v1077_v20, %v904_v52  ;;  %v1193_v32 = vadd.f32 %v1077_v20, %v905_v27  ;;  %v1194_v9 = vadd.f32 %v1077_v20, %v906_v10  ;;  %v1382_v41 = vmax.f32 %v1286_v58, 0.0 }
 0x183   :  { %v1383_v22 = vmax.f32 %v1287_v47, 0.0  ;;  %v1381_v35 = vmax.f32 %v1285_v1, 0.0  ;;  %v912_v52 = vmul.f32 %v1896_v19, %v780_v42  ;;  %v313_v27 = vmul.f32 %v3233_v61, %v3282_v36 }
 0x184   :  { %v1288_v31 = vadd.f32 %v1192_v33, %v653_v28  ;;  %v1289_v2 = vadd.f32 %v1193_v32, %v654_v57  ;;  %v1290_v4 = vadd.f32 %v1194_v9, %v655_v30 }
 0x186   :  { %v433_v38 = vpop.permute.xlu1 %432  ;;  %v1385_v16 = vmax.f32 %v1289_v2, 0.0  ;;  %v1386_v45 = vmax.f32 %v1290_v4, 0.0  ;;  %v1384_v11 = vmax.f32 %v1288_v31, 0.0 }
 0x187   :  { %v563_v21 = vmul.f32 %v2290_v25, %v433_v38  ;;  %v564_v5 = vmul.f32 %v2305_v12, %v433_v38  ;;  %v565_v60 = vmul.f32 %v2035_v44, %v433_v38 }
 0x188   :  { %v1673_v17 = vpack.c.bf16 %v1385_v16, %v1382_v41  ;;  %v1705_v8 = vpack.c.bf16 %v1386_v45, %v1383_v22  ;;  %v1675_v59 = vpack.c.bf16 %v1384_v11, %v1381_v35  ;;  %v3283_v22 = vld [vmem:[#allocation17_spill] sm:$0xff] }
 0x189   :  { %v659_v34 = vadd.f32 %v563_v21, %v312_v13  ;;  %v660_v54 = vadd.f32 %v564_v5, %v313_v27  ;;  %v661_v10 = vadd.f32 %v565_v60, %v314_v7  ;;  %v318_v38 = vmul.f32 %v3243_v46, %v3283_v22 }
 0x18a   :  { %1674 = vmatprep.subr.bf16.mxu0 %v1673_v17  ;;  %1706 = vmatprep.subr.bf16.mxu1 %v1705_v8 }
 0x18b   :  { %v776_v43 = vpop.permute.xlu1 %775  ;;  %1676 = vmatpush1.bf16.msra.mxu0 %v1675_v59  ;;  %1708 = vmatpush3.bf16.msra.mxu1 %v2677_v24  ;;  %v911_v24 = vmul.f32 %v2287_v51, %v780_v42 }
 0x18c   :  { %v907_v0 = vmul.f32 %v2284_v15, %v776_v43  ;;  %v908_v49 = vmul.f32 %v2287_v51, %v776_v43  ;;  %v909_v48 = vmul.f32 %v1896_v19, %v776_v43 }
 0x190   :  { %v1082_v40 = vpop.permute.xlu1 %1081 }
 0x191   :  { %v1195_v62 = vadd.f32 %v1082_v40, %v907_v0  ;;  %v1196_v23 = vadd.f32 %v1082_v40, %v908_v49  ;;  %v1197_v56 = vadd.f32 %v1082_v40, %v909_v48  ;;  %v319_v0 = vmul.f32 %v3233_v61, %v3283_v22  ;;  %v3284_v40 = vld [vmem:[#allocation36_spill] sm:$0xff] }
 0x192   :  { %v320_v49 = vmul.f32 %v3241_v14, %v3283_v22 }
 0x193   :  { %v1292_v63 = vadd.f32 %v1196_v23, %v2708_v39  ;;  %v1293_v6 = vadd.f32 %v1197_v56, %v2710_v3  ;;  %v1291_v18 = vadd.f32 %v1195_v62, %v2706_v29  ;;  %v788_v29 = vpop.permute.xlu0 %787  ;;  %v3286_v56 = vld [vmem:[#allocation35_spill] sm:$0xff] }
 0x194   :  { %v1087_v53 = vpop.permute.xlu1 %1086  ;;  %v916_v43 = vmul.f32 %v2284_v15, %v788_v29  ;;  %v918_v21 = vmul.f32 %v1896_v19, %v788_v29 }
 0x195   :  { %v1198_v26 = vadd.f32 %v1087_v53, %v910_v37  ;;  %v1199_v28 = vadd.f32 %v1087_v53, %v911_v24  ;;  %v1200_v57 = vadd.f32 %v1087_v53, %v912_v52  ;;  %v1388_v20 = vmax.f32 %v1292_v63, 0.0  ;;  %v3285_v24 = vld [vmem:[#allocation30_spill] sm:$0xff] }
 0x196   :  { %v1389_v1 = vmax.f32 %v1293_v6, 0.0  ;;  %v1387_v31 = vmax.f32 %v1291_v18, 0.0 }
 0x197   :  { %v1294_v30 = vadd.f32 %v1198_v26, %v659_v34  ;;  %v1295_v58 = vadd.f32 %v1199_v28, %v660_v54  ;;  %v1296_v47 = vadd.f32 %v1200_v57, %v661_v10 }
 0x199   :  { %v441_v33 = vpop.permute.xlu1 %440  ;;  %v1391_v32 = vmax.f32 %v1295_v58, 0.0  ;;  %v1392_v9 = vmax.f32 %v1296_v47, 0.0  ;;  %v1390_v2 = vmax.f32 %v1294_v30, 0.0 }
 0x19a   :  { %v569_v16 = vmul.f32 %v2290_v25, %v441_v33  ;;  %v570_v17 = vmul.f32 %v2305_v12, %v441_v33  ;;  %v571_v8 = vmul.f32 %v2035_v44, %v441_v33  ;;  %v3287_v33 = vld [vmem:[#allocation34_spill] sm:$0xff] }
 0x19b   :  { %v1677_v4 = vpack.c.bf16 %v1391_v32, %v1388_v20  ;;  %v1709_v39 = vpack.c.bf16 %v1392_v9, %v1389_v1  ;;  %v1679_v41 = vpack.c.bf16 %v1390_v2, %v1387_v31  ;;  %v796_v32 = vpop.permute.xlu0 %795  ;;  %v3288_v9 = vld [vmem:[#allocation19_spill] sm:$0xff] }
 0x19c   :  { %v665_v48 = vadd.f32 %v569_v16, %v318_v38  ;;  %v666_v5 = vadd.f32 %v570_v17, %v319_v0  ;;  %v667_v60 = vadd.f32 %v571_v8, %v320_v49  ;;  %v324_v31 = vmul.f32 %v3243_v46, %v3288_v9 }
 0x19d   :  { %1678 = vmatprep.subr.bf16.mxu0 %v1677_v4  ;;  %1710 = vmatprep.subr.bf16.mxu1 %v1709_v39  ;;  %v922_v38 = vmul.f32 %v2284_v15, %v796_v32  ;;  %v923_v16 = vmul.f32 %v2287_v51, %v796_v32  ;;  %v924_v17 = vmul.f32 %v1896_v19, %v796_v32 }
 0x19e   :  { %v784_v3 = vpop.permute.xlu1 %783  ;;  %1680 = vmatpush1.bf16.msra.mxu0 %v1679_v41  ;;  %1712 = vmatpush3.bf16.msra.mxu1 %v2681_v50  ;;  %v917_v50 = vmul.f32 %v2287_v51, %v788_v29  ;;  %v325_v8 = vmul.f32 %v3233_v61, %v3288_v9 }
 0x19f   :  { %v913_v45 = vmul.f32 %v2284_v15, %v784_v3  ;;  %v914_v35 = vmul.f32 %v2287_v51, %v784_v3  ;;  %v915_v11 = vmul.f32 %v1896_v19, %v784_v3 }
 0x1a3   :  { %v1092_v59 = vpop.permute.xlu1 %1091 }
 0x1a4   :  { %v1201_v42 = vadd.f32 %v1092_v59, %v913_v45  ;;  %v1202_v36 = vadd.f32 %v1092_v59, %v914_v35  ;;  %v1203_v13 = vadd.f32 %v1092_v59, %v915_v11  ;;  %v326_v59 = vmul.f32 %v3241_v14, %v3288_v9 }
 0x1a6   :  { %v1298_v37 = vadd.f32 %v1202_v36, %v3284_v40  ;;  %v1299_v62 = vadd.f32 %v1203_v13, %v3285_v24  ;;  %v1297_v52 = vadd.f32 %v1201_v42, %v3286_v56  ;;  %v3289_v36 = vld [vmem:[#allocation3_spill] sm:$0xff] }
 0x1a7   :  { %v1097_v23 = vpop.permute.xlu1 %1096 }
 0x1a8   :  { %v1204_v27 = vadd.f32 %v1097_v23, %v916_v43  ;;  %v1205_v7 = vadd.f32 %v1097_v23, %v917_v50  ;;  %v1206_v34 = vadd.f32 %v1097_v23, %v918_v21  ;;  %v1394_v6 = vmax.f32 %v1298_v37, 0.0  ;;  %v3290_v21 = vld [vmem:[#allocation33_spill] sm:$0xff] }
 0x1a9   :  { %v1395_v53 = vmax.f32 %v1299_v62, 0.0  ;;  %v1393_v57 = vmax.f32 %v1297_v52, 0.0 }
 0x1aa   :  { %v1300_v54 = vadd.f32 %v1204_v27, %v665_v48  ;;  %v1301_v10 = vadd.f32 %v1205_v7, %v666_v5  ;;  %v1302_v63 = vadd.f32 %v1206_v34, %v667_v60  ;;  %v3291_v48 = vld [vmem:[#allocation32_spill] sm:$0xff] }
 0x1ac   :  { %v449_v18 = vpop.permute.xlu1 %448  ;;  %v1397_v26 = vmax.f32 %v1301_v10, 0.0  ;;  %v1398_v28 = vmax.f32 %v1302_v63, 0.0  ;;  %v1396_v30 = vmax.f32 %v1300_v54, 0.0 }
 0x1ad   :  { %v575_v2 = vmul.f32 %v2290_v25, %v449_v18  ;;  %v576_v3 = vmul.f32 %v2305_v12, %v449_v18  ;;  %v577_v29 = vmul.f32 %v2035_v44, %v449_v18 }
 0x1ae   :  { %v1681_v58 = vpack.c.bf16 %v1397_v26, %v1394_v6  ;;  %v1713_v47 = vpack.c.bf16 %v1398_v28, %v1395_v53  ;;  %v1683_v20 = vpack.c.bf16 %v1396_v30, %v1393_v57  ;;  %v3292_v26 = vld [vmem:[#allocation47_spill] sm:$0xff] }
 0x1af   :  { %v671_v43 = vadd.f32 %v575_v2, %v324_v31  ;;  %v672_v50 = vadd.f32 %v576_v3, %v325_v8  ;;  %v673_v42 = vadd.f32 %v577_v29, %v326_v59 }
 0x1b0   :  { %1682 = vmatprep.subr.bf16.mxu0 %v1681_v58  ;;  %1714 = vmatprep.subr.bf16.mxu1 %v1713_v47 }
 0x1b1   :  { %v792_v1 = vpop.permute.xlu1 %791  ;;  %1684 = vmatpush1.bf16.msra.mxu0 %v1683_v20  ;;  %1716 = vmatpush3.bf16.msra.mxu1 %v3287_v33  ;;  %v3293_v33 = vld [vmem:[#allocation21_spill] sm:$0xff] }
 0x1b2   :  { %v919_v4 = vmul.f32 %v2284_v15, %v792_v1  ;;  %v920_v39 = vmul.f32 %v2287_v51, %v792_v1  ;;  %v921_v41 = vmul.f32 %v1896_v19, %v792_v1  ;;  %v330_v32 = vmul.f32 %v3243_v46, %v3293_v33 }
 0x1b6   :  { %v1102_v22 = vpop.permute.xlu1 %1101 }
 0x1b7   :  { %v1207_v45 = vadd.f32 %v1102_v22, %v919_v4  ;;  %v1208_v35 = vadd.f32 %v1102_v22, %v920_v39  ;;  %v1209_v11 = vadd.f32 %v1102_v22, %v921_v41  ;;  %v331_v4 = vmul.f32 %v3233_v61, %v3293_v33  ;;  %v804_v41 = vpop.permute.xlu0 %803 }
 0x1b8   :  { %v332_v39 = vmul.f32 %v3241_v14, %v3293_v33  ;;  %v928_v3 = vmul.f32 %v2284_v15, %v804_v41  ;;  %v929_v29 = vmul.f32 %v2287_v51, %v804_v41  ;;  %v930_v22 = vmul.f32 %v1896_v19, %v804_v41  ;;  %v3301_v41 = vld [vmem:[#allocation45_spill] sm:$0xff] }
 0x1b9   :  { %v1304_v13 = vadd.f32 %v1208_v35, %v3289_v36  ;;  %v1305_v0 = vadd.f32 %v1209_v11, %v3290_v21  ;;  %v1303_v5 = vadd.f32 %v1207_v45, %v3291_v48  ;;  %v3294_v35 = vld [vmem:[#allocation8_spill] sm:$0xff] }
 0x1ba   :  { %v1107_v49 = vpop.permute.xlu1 %1106 }
 0x1bb   :  { %v1210_v60 = vadd.f32 %v1107_v49, %v922_v38  ;;  %v1211_v40 = vadd.f32 %v1107_v49, %v923_v16  ;;  %v1212_v37 = vadd.f32 %v1107_v49, %v924_v17  ;;  %v1400_v56 = vmax.f32 %v1304_v13, 0.0  ;;  %v3295_v17 = vld [vmem:[#allocation28_spill] sm:$0xff] }
 0x1bc   :  { %v1401_v52 = vmax.f32 %v1305_v0, 0.0  ;;  %v1399_v54 = vmax.f32 %v1303_v5, 0.0 }
 0x1bd   :  { %v1306_v24 = vadd.f32 %v1210_v60, %v671_v43  ;;  %v1307_v62 = vadd.f32 %v1211_v40, %v672_v50  ;;  %v1308_v23 = vadd.f32 %v1212_v37, %v673_v42  ;;  %v3296_v43 = vld [vmem:[#allocation29_spill] sm:$0xff] }
 0x1bf   :  { %v457_v27 = vpop.permute.xlu1 %456  ;;  %v1403_v7 = vmax.f32 %v1307_v62, 0.0  ;;  %v1404_v34 = vmax.f32 %v1308_v23, 0.0  ;;  %v1402_v10 = vmax.f32 %v1306_v24, 0.0 }
 0x1c0   :  { %v581_v28 = vmul.f32 %v2290_v25, %v457_v27  ;;  %v582_v47 = vmul.f32 %v2305_v12, %v457_v27  ;;  %v583_v20 = vmul.f32 %v2035_v44, %v457_v27 }
 0x1c1   :  { %v1685_v63 = vpack.c.bf16 %v1403_v7, %v1400_v56  ;;  %v1717_v6 = vpack.c.bf16 %v1404_v34, %v1401_v52  ;;  %v1687_v53 = vpack.c.bf16 %v1402_v10, %v1399_v54  ;;  %v3297_v7 = vld [vmem:[#allocation38_spill] sm:$0xff] }
 0x1c2   :  { %v677_v38 = vadd.f32 %v581_v28, %v330_v32  ;;  %v678_v16 = vadd.f32 %v582_v47, %v331_v4  ;;  %v679_v45 = vadd.f32 %v583_v20, %v332_v39  ;;  %v3298_v28 = vld [vmem:[#allocation23_spill] sm:$0xff] }
 0x1c3   :  { %1686 = vmatprep.subr.bf16.mxu0 %v1685_v63  ;;  %1718 = vmatprep.subr.bf16.mxu1 %v1717_v6  ;;  %v812_v6 = vpop.permute.xlu0 %811  ;;  %v338_v20 = vmul.f32 %v3241_v14, %v3298_v28 }
 0x1c4   :  { %v800_v18 = vpop.permute.xlu1 %799  ;;  %1688 = vmatpush1.bf16.msra.mxu0 %v1687_v53  ;;  %1720 = vmatpush3.bf16.msra.mxu1 %v3292_v26  ;;  %v935_v33 = vmul.f32 %v2287_v51, %v812_v6 }
 0x1c5   :  { %v925_v57 = vmul.f32 %v2284_v15, %v800_v18  ;;  %v926_v30 = vmul.f32 %v2287_v51, %v800_v18  ;;  %v927_v58 = vmul.f32 %v1896_v19, %v800_v18 }
 0x1c9   :  { %v1112_v1 = vpop.permute.xlu1 %1111 }
 0x1ca   :  { %v1213_v9 = vadd.f32 %v1112_v1, %v925_v57  ;;  %v1214_v31 = vadd.f32 %v1112_v1, %v926_v30  ;;  %v1215_v2 = vadd.f32 %v1112_v1, %v927_v58  ;;  %v336_v57 = vmul.f32 %v3243_v46, %v3298_v28 }
 0x1cb   :  { %v934_v1 = vmul.f32 %v2284_v15, %v812_v6 }
 0x1cc   :  { %v1310_v11 = vadd.f32 %v1214_v31, %v3294_v35  ;;  %v1311_v8 = vadd.f32 %v1215_v2, %v3295_v17  ;;  %v1309_v50 = vadd.f32 %v1213_v9, %v3296_v43  ;;  %v3299_v31 = vld [vmem:[#allocation5_spill] sm:$0xff]  ;;  %v3300_v2 = vld [vmem:[#allocation46_spill] sm:$0xff] }
 0x1cd   :  { %v1117_v59 = vpop.permute.xlu1 %1116  ;;  %v1417_v43 = vld [vmem:[%s3130_s3] sm:$0xff] }
 0x1ce   :  { %v1216_v42 = vadd.f32 %v1117_v59, %v928_v3  ;;  %v1217_v36 = vadd.f32 %v1117_v59, %v929_v29  ;;  %v1218_v13 = vadd.f32 %v1117_v59, %v930_v22  ;;  %v1406_v48 = vmax.f32 %v1310_v11, 0.0 }
 0x1cf   :  { %v1407_v5 = vmax.f32 %v1311_v8, 0.0  ;;  %v1405_v24 = vmax.f32 %v1309_v50, 0.0  ;;  %v1420_v50 = vld [vmem:[%s3130_s3 + $0x18] sm:$0xff] }
 0x1d0   :  { %v1312_v21 = vadd.f32 %v1216_v42, %v677_v38  ;;  %v1313_v0 = vadd.f32 %v1217_v36, %v678_v16  ;;  %v1314_v49 = vadd.f32 %v1218_v13, %v679_v45  ;;  %v1419_v42 = vld [vmem:[%s3130_s3 + $0x10] sm:$0xff] }
 0x1d2   :  { %v465_v60 = vpop.permute.xlu1 %464  ;;  %v1409_v40 = vmax.f32 %v1313_v0, 0.0  ;;  %v1410_v37 = vmax.f32 %v1314_v49, 0.0  ;;  %v1408_v62 = vmax.f32 %v1312_v21, 0.0 }
 0x1d3   :  { %v587_v34 = vmul.f32 %v2290_v25, %v465_v60  ;;  %v588_v53 = vmul.f32 %v2305_v12, %v465_v60  ;;  %v589_v18 = vmul.f32 %v2035_v44, %v465_v60  ;;  %v337_v25 = vmul.f32 %v3233_v61, %v3298_v28 }
 0x1d4   :  { %v1689_v23 = vpack.c.bf16 %v1409_v40, %v1406_v48  ;;  %v1721_v56 = vpack.c.bf16 %v1410_v37, %v1407_v5  ;;  %v1691_v52 = vpack.c.bf16 %v1408_v62, %v1405_v24  ;;  %v936_v12 = vmul.f32 %v1896_v19, %v812_v6 }
 0x1d5   :  { %v683_v44 = vadd.f32 %v587_v34, %v336_v57  ;;  %v684_v32 = vadd.f32 %v588_v53, %v337_v25  ;;  %v685_v9 = vadd.f32 %v589_v18, %v338_v20 }
 0x1d6   :  { %1690 = vmatprep.subr.bf16.mxu0 %v1689_v23  ;;  %1722 = vmatprep.subr.bf16.mxu1 %v1721_v56 }
 0x1d7   :  { %v808_v27 = vpop.permute.xlu1 %807  ;;  %1692 = vmatpush1.bf16.msra.mxu0 %v1691_v52  ;;  %1724 = vmatpush3.bf16.msra.mxu1 %v3297_v7 }
 0x1d8   :  { %v931_v54 = vmul.f32 %v2284_v15, %v808_v27  ;;  %v932_v10 = vmul.f32 %v2287_v51, %v808_v27  ;;  %v933_v63 = vmul.f32 %v1896_v19, %v808_v27 }
 0x1dc   :  { %v1122_v26 = vpop.permute.xlu1 %1121 }
 0x1dd   :  { %v1219_v30 = vadd.f32 %v1122_v26, %v931_v54  ;;  %v1220_v58 = vadd.f32 %v1122_v26, %v932_v10  ;;  %v1221_v47 = vadd.f32 %v1122_v26, %v933_v63 }
 0x1df   :  { %v1316_v46 = vadd.f32 %v1220_v58, %v3299_v31  ;;  %v1317_v4 = vadd.f32 %v1221_v47, %v3300_v2  ;;  %v1315_v3 = vadd.f32 %v1219_v30, %v3301_v41 }
 0x1e0   :  { %v1127_v39 = vpop.permute.xlu1 %1126 }
 0x1e1   :  { %v1222_v61 = vadd.f32 %v1127_v39, %v934_v1  ;;  %v1223_v29 = vadd.f32 %v1127_v39, %v935_v33  ;;  %v1224_v22 = vadd.f32 %v1127_v39, %v936_v12  ;;  %v1412_v16 = vmax.f32 %v1316_v46, 0.0 }
 0x1e2   :  { %v1413_v51 = vmax.f32 %v1317_v4, 0.0  ;;  %v1411_v35 = vmax.f32 %v1315_v3, 0.0 }
 0x1e3   :  { %v1318_v14 = vadd.f32 %v1222_v61, %v683_v44  ;;  %v1319_v38 = vadd.f32 %v1223_v29, %v684_v32  ;;  %v1320_v15 = vadd.f32 %v1224_v22, %v685_v9 }
 0x1e4   :  { %v1431_v60 = vpop.permute.xlu1 %1430 }
 0x1e5   :  { %v1415_v45 = vmax.f32 %v1319_v38, 0.0  ;;  %v1416_v19 = vmax.f32 %v1320_v15, 0.0  ;;  %v1414_v11 = vmax.f32 %v1318_v14, 0.0 }
 0x1e6   :  { %v1426_v36 = vpop.permute.xlu0 %1425 }
 0x1e7   :  { %v1693_v17 = vpack.c.bf16 %v1415_v45, %v1412_v16  ;;  %v1725_v8 = vpack.c.bf16 %v1416_v19, %v1413_v51  ;;  %v1695_v59 = vpack.c.bf16 %v1414_v11, %v1411_v35 }
 0x1e9   :  { %1694 = vmatprep.subr.bf16.mxu0 %v1693_v17  ;;  %1726 = vmatprep.subr.bf16.mxu1 %v1725_v8 }
 0x1ea   :  { %1696 = vmatpush1.bf16.msra.mxu0 %v1695_v59  ;;  %1728 = vmatpush3.bf16.msra.mxu1 %v2932_v55 }
 0x1ed   :  { %1498 = vmatmul.mubr.f32.vlgmr.msra.gmra.mrb[0].mxu0 %v1417_v43  ;;  %1575 = vmatmul.mubr.f32.vlgmr.msra.gmra.mrb[0].mxu1 %v1417_v43 }
 0x1ee   :  { %1503 = vmatprep.mubr.f32.mxu0 %v1420_v50  ;;  %1579 = vmatprep.mubr.f32.mxu1 %v1420_v50 }
 0x1f1   :  { %1504 = vmatmul.mubr.f32.gmra.mrb[2].mxu0 %v1419_v42  ;;  %1580 = vmatmul.mubr.f32.gmra.mrb[2].mxu1 %v1419_v42 }
 0x2c0   :  { %v1627_v55 = vpop.f32.mrb[0].mxu1  ;;  %v1499_v13 = vpop.f32.mrb[0].mxu0 }
 0x2c1   :  { %v1628_v21 = vpop.f32.mrb[1].mxu1  ;;  %v1500_v0 = vadd.f32 %v1499_v13, %v1426_v36  ;;  %v1501_v49 = vpop.f32.mrb[1].mxu0 }
 0x2c2   :  { %v1629_v48 = vadd.f32 %v1628_v21, %v1627_v55  ;;  %v1502_v5 = vadd.f32 %v1501_v49, %v1426_v36 }
 0x2c3   :  { %1585 = vst [vmem:[%s3131_s5] sm:$0xff] %v1500_v0 }
 0x2c4   :  { %v1577_v40 = vadd.f32 %v1629_v48, %v1426_v36  ;;  %1586 = vst [vmem:[%s3131_s5 + $0x8] sm:$0xff] %v1502_v5  ;;  %v1505_v37 = vpop.f32.mrb[2].mxu0  ;;  %v1630_v24 = vpop.f32.mrb[2].mxu1 }
 0x2c5   :  { %v1506_v62 = vadd.f32 %v1505_v37, %v1431_v60  ;;  %v1507_v23 = vpop.f32.mrb[3].mxu0  ;;  %v1631_v56 = vpop.f32.mrb[3].mxu1 }
 0x2c6   :  { %1587 = vst [vmem:[%s3131_s5 + $0x10] sm:$0xff] %v1577_v40  ;;  %v1508_v52 = vadd.f32 %v1507_v23, %v1431_v60  ;;  %v1632_v27 = vadd.f32 %v1631_v56, %v1630_v24 }
 0x2c7   :  { %1588 = vst [vmem:[%s3131_s5 + $0x18] sm:$0xff] %v1506_v62 }
 0x2c8   :  { %1589 = vst [vmem:[%s3131_s5 + $0x20] sm:$0xff] %v1508_v52  ;;  %v1582_v7 = vadd.f32 %v1632_v27, %v1431_v60 }
 0x2ca   :  { %1590 = vst [vmem:[%s3131_s5 + $0x28] sm:$0xff] %v1582_v7 }

</bundles_post_ra>
